<compile_context>
chip_gen: v5e
topology: v5e:2x2
jax: 0.10.0
libtpu: 0.0.40
codegen_flags: <defaults>
</compile_context>

<pallas_src>
import functools

import numpy as np
import jax
import jax.numpy as jnp
from jax import lax
from jax.experimental import pallas as pl
from jax.experimental.pallas import tpu as pltpu


NEG_POS_RATIO = 3  # hard_negative_mining(..., 3.0) in the reference module


def _ssd_multibox_loss_kernel(confs_ref, labels_ref, bbox_ref, gtbox_ref, anchprep_ref,
                              out_ref, *, scale_xy, scale_wh, class_chunk):
    labels = labels_ref[...]                        # (Bt, 1, A) int32
    Bt, C, A = confs_ref.shape

    # ------------- streamed (online) log-softmax over the class axis -------------
    # Running max m, rescaled sum-exp s, and the logit picked at the gt label.
    # Chunks use static offsets (zero-cost ref views, sublane-aligned when
    # class_chunk is a multiple of 8).
    Cc = min(int(class_chunk), C)
    nfull = C // Cc
    rem = C - nfull * Cc

    m = jnp.full((Bt, 1, A), -jnp.inf, jnp.float32)
    s = jnp.zeros((Bt, 1, A), jnp.float32)
    picked = jnp.zeros((Bt, 1, A), jnp.float32)

    def process_chunk(c0, csz, m, s, picked):
        chunk = confs_ref[:, c0:c0 + csz, :].astype(jnp.float32)        # (Bt,csz,A)
        cls_idx = c0 + lax.broadcasted_iota(jnp.int32, (Bt, csz, A), 1)
        local_max = jnp.max(chunk, axis=1, keepdims=True)
        m_new = jnp.maximum(m, local_max)
        s = s * jnp.exp(m - m_new) + jnp.sum(jnp.exp(chunk - m_new),
                                             axis=1, keepdims=True)
        # per-anchor gt-label logit (no one-hot f32 intermediate)
        picked = picked + jnp.sum(jnp.where(cls_idx == labels, chunk, 0.0),
                                  axis=1, keepdims=True)
        return m_new, s, picked

    for ci in range(nfull):                                             # static loop
        m, s, picked = process_chunk(ci * Cc, Cc, m, s, picked)
    if rem > 0:
        m, s, picked = process_chunk(nfull * Cc, rem, m, s, picked)

    lse = jnp.log(s) + m                                                # (Bt,1,A)
    bg = confs_ref[:, 0:1, :].astype(jnp.float32)                       # background logits

    # "-F.log_softmax(confs, dim=1)[:, 0]"  (background loss used for mining), >= 0
    to_log = lse - bg                                                   # (Bt,1,A)
    # per-anchor cross entropy: lse - confs[label]
    ce = lse - picked                                                   # (Bt,1,A)

    # ---------------- hard negative mining (per image) ----------------
    pos_mask = labels > 0                                               # (Bt,1,A)
    num_pos = jnp.sum(jnp.where(pos_mask, jnp.int32(1), jnp.int32(0)),
                      axis=2, keepdims=True)                            # (Bt,1,1)
    num_neg = num_pos * NEG_POS_RATIO                                   # (Bt,1,1)

    # Orderable int32 key: bitcast of non-negative f32 is monotone in value;
    # positive anchors get key = -1 so they are never selected as negatives.
    key = jnp.where(pos_mask, jnp.int32(-1),
                    pltpu.bitcast(jnp.maximum(to_log, 0.0), jnp.int32))  # (Bt,1,A)

    # Binary search (per image, vectorized over Bt) for the largest threshold t with
    # count(key >= t) >= num_neg; falls back to t = 0 (all negatives) when num_neg
    # exceeds the number of negatives.  32 fixed steps cover the int32 range; body
    # is 4x unrolled inside the fori loop to cut loop overhead and let the LLO
    # scheduler hide the XLU reduce latency.
    def bs_step(carry):
        lo, hi = carry
        diff = hi - lo
        mid = lo + (diff >> 1) + (diff & 1)                             # ceil midpoint, no overflow
        cnt = jnp.sum(jnp.where(key >= mid, jnp.int32(1), jnp.int32(0)),
                      axis=2, keepdims=True)                            # (Bt,1,1)
        take = cnt >= num_neg
        return jnp.where(take, mid, lo), jnp.where(take, hi, mid - 1)

    def bs_body(_, carry):
        for _ in range(4):                                              # unrolled x4
            carry = bs_step(carry)
        return carry

    lo0 = jnp.zeros((Bt, 1, 1), jnp.int32)
    hi0 = jnp.full((Bt, 1, 1), jnp.iinfo(jnp.int32).max, jnp.int32)
    thr, _ = lax.fori_loop(0, 8, bs_body, (lo0, hi0))

    # NOTE: exact float ties at the num_neg boundary may admit one extra tied
    # negative vs torch.sort's stable ordering (numerically negligible).
    neg_mask = key >= thr                                               # (Bt,1,A)
    mask = jnp.logical_or(pos_mask, neg_mask)

    cls_sum = jnp.sum(jnp.where(mask, ce, 0.0))

    # ---------------- localization (SmoothL1 on positives) ----------------
    pred_loc = bbox_ref[...].astype(jnp.float32)                        # (Bt,4,A)
    gt_loc = gtbox_ref[...].astype(jnp.float32)                         # (Bt,4,A) xywh
    ap = anchprep_ref[...]                                              # (1,6,A) f32
    anch_xy, inv_wh, log_wh = ap[:, 0:2, :], ap[:, 2:4, :], ap[:, 4:6, :]

    gxy = scale_xy * (gt_loc[:, 0:2, :] - anch_xy) * inv_wh             # (Bt,2,A)
    gwh = scale_wh * (jnp.log(gt_loc[:, 2:4, :]) - log_wh)              # (Bt,2,A)

    def smooth_l1(pred, tgt):
        d = pred - tgt
        ad = jnp.abs(d)
        return jnp.where(ad < 1.0, 0.5 * d * d, ad - 0.5)

    sl1_xy = smooth_l1(pred_loc[:, 0:2, :], gxy)
    sl1_wh = smooth_l1(pred_loc[:, 2:4, :], gwh)
    reg_sum = (jnp.sum(jnp.where(pos_mask, sl1_xy, 0.0))
               + jnp.sum(jnp.where(pos_mask, sl1_wh, 0.0)))

    npos_f = jnp.sum(num_pos).astype(jnp.float32)

    # ---------------- per-block partials into a lane-dense (1,8,128) tile ----------------
    row = lax.broadcasted_iota(jnp.int32, (1, 8, 128), 1)
    lane = lax.broadcasted_iota(jnp.int32, (1, 8, 128), 2)
    vals = jnp.where((row == 0) & (lane == 0), reg_sum, jnp.float32(0.0))
    vals = jnp.where((row == 0) & (lane == 1), cls_sum, vals)
    vals = jnp.where((row == 0) & (lane == 2), npos_f, vals)
    out_ref[...] = vals


def _pick_block_batch(N, block_batch):
    """Largest divisor of N that is <= block_batch, capped so the grid has >= 2 steps."""
    cap = max(1, min(int(block_batch), N))
    if N >= 2:
        cap = min(cap, max(1, N // 2))   # keep both v7x TensorCores busy
    for bt in range(cap, 0, -1):
        if N % bt == 0:
            return bt
    return 1


def _vmem_limit_bytes():
    try:
        cap = int(pltpu.get_tpu_info().vmem_capacity_bytes)
    except Exception:
        return 64 * 1024 * 1024
    # v5e/v6e (128 MiB) -> 96 MiB scoped; v7x (64 MiB) -> 48 MiB scoped.
    return min(cap * 3 // 4, 100 * 1024 * 1024)


def ssd_multibox_loss(bbox_delta, confs, gt_bbox, gt_labels, anchors_xywh,
                      scale_xy, scale_wh, *, block_batch=4, class_chunk=16):
    """Pallas-backed equivalent of SSDMultiboxLoss.forward.

    confs / bbox_delta / gt_bbox may be bf16 (recommended on HBM-bound v5e/v6e);
    the kernel casts to f32 internally.  class_chunk should be a multiple of 8.
    """
    N, C, A = confs.shape
    assert bbox_delta.shape == (N, 4, A)
    assert gt_bbox.shape == (N, A, 4)
    assert gt_labels.shape == (N, A)
    assert anchors_xywh.shape == (1, 4, A)

    # glue: the torch module transposes gt_bbox to [N, 4, A]
    gt_bbox_t = jnp.transpose(gt_bbox, (0, 2, 1))
    labels = gt_labels.astype(jnp.int32).reshape(N, 1, A)

    # hoisted anchor math: [anch_xy, 1/anch_wh, log(anch_wh)]  -> (1, 6, A)
    anch = anchors_xywh.astype(jnp.float32)
    anch_prep = jnp.concatenate(
        [anch[:, 0:2, :], 1.0 / anch[:, 2:4, :], jnp.log(anch[:, 2:4, :])], axis=1)

    # Bt divides N exactly: no host-side padding copy of confs.
    Bt = _pick_block_batch(N, block_batch)
    G = N // Bt

    kernel = functools.partial(_ssd_multibox_loss_kernel,
                               scale_xy=float(scale_xy), scale_wh=float(scale_wh),
                               class_chunk=int(class_chunk))

    partials = pl.pallas_call(
        kernel,
        out_shape=jax.ShapeDtypeStruct((G, 8, 128), jnp.float32),
        grid_spec=pltpu.PrefetchScalarGridSpec(
            num_scalar_prefetch=0,
            grid=(G,),
            in_specs=[
                pl.BlockSpec((Bt, C, A), lambda b: (b, 0, 0)),   # confs (any float dtype)
                pl.BlockSpec((Bt, 1, A), lambda b: (b, 0, 0)),   # labels
                pl.BlockSpec((Bt, 4, A), lambda b: (b, 0, 0)),   # bbox_delta
                pl.BlockSpec((Bt, 4, A), lambda b: (b, 0, 0)),   # gt_bbox (transposed)
                pl.BlockSpec((1, 6, A), lambda b: (0, 0, 0)),    # precomputed anchors
            ],
            out_specs=pl.BlockSpec((1, 8, 128), lambda b: (b, 0, 0)),
        ),
        compiler_params=pltpu.CompilerParams(
            dimension_semantics=("parallel",),      # independent per-block partials
            vmem_limit_bytes=_vmem_limit_bytes()),
    )(confs, labels, bbox_delta, gt_bbox_t, anch_prep)

    sums = jnp.sum(partials, axis=0)                # (8, 128)
    reg_sum, cls_sum, num_pos = sums[0, 0], sums[0, 1], sums[0, 2]

    # Same semantics as the reference module: division by num_pos is unguarded,
    # exactly like the PyTorch forward (zero positives in the batch -> inf/NaN).
    regression_loss = reg_sum / num_pos
    classification_loss = cls_sum / num_pos
    total_loss = regression_loss + classification_loss
    to_log = dict(regression_loss=regression_loss,
                  classification_loss=classification_loss,
                  total_loss=total_loss)
    return total_loss, to_log


# ------------------------- pure-JAX reference (for verification) -------------------------
def ssd_multibox_loss_reference(bbox_delta, confs, gt_bbox, gt_labels, anchors,
                                scale_xy, scale_wh):
    gt_bbox_t = jnp.transpose(gt_bbox, (0, 2, 1))
    logp = jax.nn.log_softmax(confs, axis=1)
    to_log = -logp[:, 0]                                   # (N, A)
    pos_mask = gt_labels > 0
    num_pos_img = jnp.sum(pos_mask, axis=1, keepdims=True)
    num_neg = num_pos_img * NEG_POS_RATIO
    loss = jnp.where(pos_mask, -jnp.inf, to_log)
    indexes = jnp.argsort(-loss, axis=1)
    orders = jnp.argsort(indexes, axis=1)
    neg_mask = orders < num_neg
    mask = pos_mask | neg_mask
    ce = -jnp.take_along_axis(logp, gt_labels[:, None, :], axis=1)[:, 0]
    cls_sum = jnp.sum(jnp.where(mask, ce, 0.0))
    gxy = scale_xy * (gt_bbox_t[:, :2] - anchors[:, :2]) / anchors[:, 2:]
    gwh = scale_wh * jnp.log(gt_bbox_t[:, 2:] / anchors[:, 2:])
    gt_vec = jnp.concatenate([gxy, gwh], axis=1)
    d = bbox_delta - gt_vec
    ad = jnp.abs(d)
    sl1 = jnp.where(ad < 1.0, 0.5 * d * d, ad - 0.5)
    reg_sum = jnp.sum(jnp.where(pos_mask[:, None, :], sl1, 0.0))
    npos = jnp.sum(pos_mask).astype(jnp.float32)
    reg = reg_sum / npos
    cls = cls_sum / npos
    return reg + cls, dict(regression_loss=reg, classification_loss=cls, total_loss=reg + cls)


if __name__ == "__main__":
    key = jax.random.PRNGKey(0)
    N, C = 4, 8
    FM = 16
    A = FM * FM  # 256 anchors

    k1, k2, k3, k4, k5, k6 = jax.random.split(key, 6)
    bbox_delta = jax.random.normal(k1, (N, 4, A), jnp.float32)
    confs = jax.random.normal(k2, (N, C, A), jnp.float32)
    cxcy = jax.random.uniform(k3, (N, A, 2), jnp.float32, 0.0, 1.0)
    wh = jax.random.uniform(k4, (N, A, 2), jnp.float32, 0.1, 0.9)
    gt_bbox = jnp.concatenate([cxcy, wh], axis=-1)                      # [N, A, 4] xywh
    is_pos = jax.random.bernoulli(k5, 0.3, (N, A))
    cls_ids = jax.random.randint(k6, (N, A), 1, C)
    gt_labels = jnp.where(is_pos, cls_ids, 0).astype(jnp.int32)         # [N, A]

    # deterministic anchors (the module's fixed nn.Parameter of shape [1, 4, A], xywh)
    gy, gx = jnp.meshgrid(jnp.arange(FM, dtype=jnp.float32),
                          jnp.arange(FM, dtype=jnp.float32), indexing="ij")
    cx = (gx.reshape(-1) + 0.5) / FM
    cy = (gy.reshape(-1) + 0.5) / FM
    w = jnp.full((A,), 0.2, jnp.float32)
    h = jnp.full((A,), 0.25, jnp.float32)
    anchors = jnp.stack([cx, cy, w, h], axis=0)[None]                   # [1, 4, A]

    # SSD defaults: anchors.scale_xy = 0.1, anchors.scale_wh = 0.2
    scale_xy = 1.0 / 0.1
    scale_wh = 1.0 / 0.2

    total_loss, logs = ssd_multibox_loss(bbox_delta, confs, gt_bbox, gt_labels,
                                         anchors, scale_xy, scale_wh,
                                         block_batch=2, class_chunk=16)
    jax.block_until_ready(total_loss)

    ref_total, ref_logs = ssd_multibox_loss_reference(bbox_delta, confs, gt_bbox,
                                                      gt_labels, anchors,
                                                      scale_xy, scale_wh)
    np.testing.assert_allclose(np.asarray(total_loss), np.asarray(ref_total),
                               rtol=1e-3, atol=1e-3)
    np.testing.assert_allclose(np.asarray(logs["regression_loss"]),
                               np.asarray(ref_logs["regression_loss"]),
                               rtol=1e-3, atol=1e-3)
    np.testing.assert_allclose(np.asarray(logs["classification_loss"]),
                               np.asarray(ref_logs["classification_loss"]),
                               rtol=1e-3, atol=1e-3)
    print("KERNEL_OK")
</pallas_src>

<mosaic_0001>
module attributes {stable_mosaic.version = 11 : i64} {
  func.func @_ssd_multibox_loss_kernel(%arg0: i32, %arg1: memref<2x8x256xf32, #tpu.memory_space<vmem>>, %arg2: memref<2x1x256xi32, #tpu.memory_space<vmem>>, %arg3: memref<2x4x256xf32, #tpu.memory_space<vmem>>, %arg4: memref<2x4x256xf32, #tpu.memory_space<vmem>>, %arg5: memref<1x6x256xf32, #tpu.memory_space<vmem>>, %arg6: memref<1x8x128xf32, #tpu.memory_space<vmem>>) attributes {dimension_semantics = [#tpu.dimension_semantics<parallel>], iteration_bounds = array<i64: 2>, scalar_prefetch = 0 : i64, scratch_operands = 0 : i64, tpu.core_type = #tpu.core_type<tc>, window_params = [{transform_indices = @transform_0, window_bounds = array<i64: 2, 8, 256>}, {transform_indices = @transform_1, window_bounds = array<i64: 2, 1, 256>}, {transform_indices = @transform_2, window_bounds = array<i64: 2, 4, 256>}, {transform_indices = @transform_3, window_bounds = array<i64: 2, 4, 256>}, {pipeline_mode = #tpu.pipeline_mode<synchronous>, transform_indices = @transform_4, window_bounds = array<i64: 1, 6, 256>}, {transform_indices = @transform_5, window_bounds = array<i64: 1, 8, 128>}]} {
    %c0 = arith.constant 0 : index
    %c0_0 = arith.constant 0 : index
    %c0_1 = arith.constant 0 : index
    %0 = vector.load %arg2[%c0, %c0_0, %c0_1] : memref<2x1x256xi32, #tpu.memory_space<vmem>>, vector<2x1x256xi32>
    %cst = arith.constant 0xFF800000 : f32
    %1 = vector.broadcast %cst : f32 to vector<2x1x256xf32>
    %cst_2 = arith.constant 0.000000e+00 : f32
    %2 = vector.broadcast %cst_2 : f32 to vector<2x1x256xf32>
    %cst_3 = arith.constant 0.000000e+00 : f32
    %3 = vector.broadcast %cst_3 : f32 to vector<2x1x256xf32>
    %c0_4 = arith.constant 0 : index
    %c0_5 = arith.constant 0 : index
    %c0_6 = arith.constant 0 : index
    %4 = vector.load %arg1[%c0_4, %c0_5, %c0_6] : memref<2x8x256xf32, #tpu.memory_space<vmem>>, vector<2x8x256xf32>
    %5 = tpu.iota {dimensions = array<i32: 1>} : vector<2x8x256xi32>
    %c0_i32 = arith.constant 0 : i32
    %6 = vector.broadcast %c0_i32 : i32 to vector<2x8x256xi32>
    %7 = arith.addi %6, %5 : vector<2x8x256xi32>
    %cst_7 = arith.constant dense<0xFF800000> : vector<2x256xf32>
    %8 = vector.multi_reduction <maximumf>, %4, %cst_7 [1] : vector<2x8x256xf32> to vector<2x256xf32>
    %9 = vector.shape_cast %8 : vector<2x256xf32> to vector<2x1x256xf32>
    %10 = arith.maximumf %1, %9 : vector<2x1x256xf32>
    %11 = arith.subf %1, %10 : vector<2x1x256xf32>
    %12 = math.exp %11 : vector<2x1x256xf32>
    %13 = arith.mulf %2, %12 : vector<2x1x256xf32>
    %14 = vector.broadcast %10 : vector<2x1x256xf32> to vector<2x8x256xf32>
    %15 = arith.subf %4, %14 : vector<2x8x256xf32>
    %16 = math.exp %15 : vector<2x8x256xf32>
    %cst_8 = arith.constant dense<0.000000e+00> : vector<2x256xf32>
    %17 = vector.multi_reduction <add>, %16, %cst_8 [1] : vector<2x8x256xf32> to vector<2x256xf32>
    %18 = vector.shape_cast %17 : vector<2x256xf32> to vector<2x1x256xf32>
    %19 = arith.addf %13, %18 : vector<2x1x256xf32>
    %20 = vector.broadcast %0 : vector<2x1x256xi32> to vector<2x8x256xi32>
    %21 = arith.cmpi eq, %7, %20 : vector<2x8x256xi32>
    %cst_9 = arith.constant 0.000000e+00 : f32
    %22 = vector.broadcast %cst_9 : f32 to vector<2x8x256xf32>
    %23 = arith.select %21, %4, %22 : vector<2x8x256xi1>, vector<2x8x256xf32>
    %cst_10 = arith.constant dense<0.000000e+00> : vector<2x256xf32>
    %24 = vector.multi_reduction <add>, %23, %cst_10 [1] : vector<2x8x256xf32> to vector<2x256xf32>
    %25 = vector.shape_cast %24 : vector<2x256xf32> to vector<2x1x256xf32>
    %26 = arith.addf %3, %25 : vector<2x1x256xf32>
    %27 = math.log %19 : vector<2x1x256xf32>
    %28 = arith.addf %27, %10 : vector<2x1x256xf32>
    %c0_11 = arith.constant 0 : index
    %c0_12 = arith.constant 0 : index
    %c0_13 = arith.constant 0 : index
    %29 = vector.load %arg1[%c0_11, %c0_12, %c0_13] : memref<2x8x256xf32, #tpu.memory_space<vmem>>, vector<2x1x256xf32>
    %30 = arith.subf %28, %29 : vector<2x1x256xf32>
    %31 = arith.subf %28, %26 : vector<2x1x256xf32>
    %c0_i32_14 = arith.constant 0 : i32
    %32 = vector.broadcast %c0_i32_14 : i32 to vector<2x1x256xi32>
    %33 = arith.cmpi sgt, %0, %32 : vector<2x1x256xi32>
    %c1_i32 = arith.constant 1 : i32
    %c0_i32_15 = arith.constant 0 : i32
    %34 = vector.broadcast %c1_i32 : i32 to vector<2x1x256xi32>
    %35 = vector.broadcast %c0_i32_15 : i32 to vector<2x1x256xi32>
    %36 = arith.select %33, %34, %35 : vector<2x1x256xi1>, vector<2x1x256xi32>
    %cst_16 = arith.constant dense<0> : vector<2x1xi32>
    %37 = vector.multi_reduction <add>, %36, %cst_16 [2] : vector<2x1x256xi32> to vector<2x1xi32>
    %38 = vector.shape_cast %37 : vector<2x1xi32> to vector<2x1x1xi32>
    %c3_i32 = arith.constant 3 : i32
    %39 = vector.broadcast %c3_i32 : i32 to vector<2x1x1xi32>
    %40 = arith.muli %38, %39 : vector<2x1x1xi32>
    %cst_17 = arith.constant 0.000000e+00 : f32
    %41 = vector.broadcast %cst_17 : f32 to vector<2x1x256xf32>
    %42 = arith.maximumf %30, %41 : vector<2x1x256xf32>
    %43 = tpu.bitcast %42 : vector<2x1x256xf32> -> vector<2x1x256xi32>
    %c-1_i32 = arith.constant -1 : i32
    %44 = vector.broadcast %c-1_i32 : i32 to vector<2x1x256xi32>
    %45 = arith.select %33, %44, %43 : vector<2x1x256xi1>, vector<2x1x256xi32>
    %c0_i32_18 = arith.constant 0 : i32
    %46 = vector.broadcast %c0_i32_18 : i32 to vector<2x1x1xi32>
    %c2147483647_i32 = arith.constant 2147483647 : i32
    %47 = vector.broadcast %c2147483647_i32 : i32 to vector<2x1x1xi32>
    %c0_i32_19 = arith.constant 0 : i32
    %c8_i32 = arith.constant 8 : i32
    %48 = arith.addi %c0_i32_19, %c8_i32 : i32
    %c1_i32_20 = arith.constant 1 : i32
    %49:2 = scf.for %arg7 = %c0_i32_19 to %48 step %c1_i32_20 iter_args(%arg8 = %46, %arg9 = %47) -> (vector<2x1x1xi32>, vector<2x1x1xi32>)  : i32 {
      %147 = arith.subi %arg9, %arg8 : vector<2x1x1xi32>
      %c1_i32_54 = arith.constant 1 : i32
      %148 = vector.broadcast %c1_i32_54 : i32 to vector<2x1x1xi32>
      %149 = arith.shrsi %147, %148 : vector<2x1x1xi32>
      %150 = arith.addi %arg8, %149 : vector<2x1x1xi32>
      %c1_i32_55 = arith.constant 1 : i32
      %151 = vector.broadcast %c1_i32_55 : i32 to vector<2x1x1xi32>
      %152 = arith.andi %147, %151 : vector<2x1x1xi32>
      %153 = arith.addi %150, %152 : vector<2x1x1xi32>
      %154 = vector.broadcast %153 : vector<2x1x1xi32> to vector<2x1x256xi32>
      %155 = arith.cmpi sge, %45, %154 : vector<2x1x256xi32>
      %c1_i32_56 = arith.constant 1 : i32
      %c0_i32_57 = arith.constant 0 : i32
      %156 = vector.broadcast %c1_i32_56 : i32 to vector<2x1x256xi32>
      %157 = vector.broadcast %c0_i32_57 : i32 to vector<2x1x256xi32>
      %158 = arith.select %155, %156, %157 : vector<2x1x256xi1>, vector<2x1x256xi32>
      %cst_58 = arith.constant dense<0> : vector<2x1xi32>
      %159 = vector.multi_reduction <add>, %158, %cst_58 [2] : vector<2x1x256xi32> to vector<2x1xi32>
      %160 = vector.shape_cast %159 : vector<2x1xi32> to vector<2x1x1xi32>
      %161 = arith.cmpi sge, %160, %40 : vector<2x1x1xi32>
      %162 = arith.select %161, %153, %arg8 : vector<2x1x1xi1>, vector<2x1x1xi32>
      %c1_i32_59 = arith.constant 1 : i32
      %163 = vector.broadcast %c1_i32_59 : i32 to vector<2x1x1xi32>
      %164 = arith.subi %153, %163 : vector<2x1x1xi32>
      %165 = arith.select %161, %arg9, %164 : vector<2x1x1xi1>, vector<2x1x1xi32>
      %166 = arith.subi %165, %162 : vector<2x1x1xi32>
      %c1_i32_60 = arith.constant 1 : i32
      %167 = vector.broadcast %c1_i32_60 : i32 to vector<2x1x1xi32>
      %168 = arith.shrsi %166, %167 : vector<2x1x1xi32>
      %169 = arith.addi %162, %168 : vector<2x1x1xi32>
      %c1_i32_61 = arith.constant 1 : i32
      %170 = vector.broadcast %c1_i32_61 : i32 to vector<2x1x1xi32>
      %171 = arith.andi %166, %170 : vector<2x1x1xi32>
      %172 = arith.addi %169, %171 : vector<2x1x1xi32>
      %173 = vector.broadcast %172 : vector<2x1x1xi32> to vector<2x1x256xi32>
      %174 = arith.cmpi sge, %45, %173 : vector<2x1x256xi32>
      %c1_i32_62 = arith.constant 1 : i32
      %c0_i32_63 = arith.constant 0 : i32
      %175 = vector.broadcast %c1_i32_62 : i32 to vector<2x1x256xi32>
      %176 = vector.broadcast %c0_i32_63 : i32 to vector<2x1x256xi32>
      %177 = arith.select %174, %175, %176 : vector<2x1x256xi1>, vector<2x1x256xi32>
      %cst_64 = arith.constant dense<0> : vector<2x1xi32>
      %178 = vector.multi_reduction <add>, %177, %cst_64 [2] : vector<2x1x256xi32> to vector<2x1xi32>
      %179 = vector.shape_cast %178 : vector<2x1xi32> to vector<2x1x1xi32>
      %180 = arith.cmpi sge, %179, %40 : vector<2x1x1xi32>
      %181 = arith.select %180, %172, %162 : vector<2x1x1xi1>, vector<2x1x1xi32>
      %c1_i32_65 = arith.constant 1 : i32
      %182 = vector.broadcast %c1_i32_65 : i32 to vector<2x1x1xi32>
      %183 = arith.subi %172, %182 : vector<2x1x1xi32>
      %184 = arith.select %180, %165, %183 : vector<2x1x1xi1>, vector<2x1x1xi32>
      %185 = arith.subi %184, %181 : vector<2x1x1xi32>
      %c1_i32_66 = arith.constant 1 : i32
      %186 = vector.broadcast %c1_i32_66 : i32 to vector<2x1x1xi32>
      %187 = arith.shrsi %185, %186 : vector<2x1x1xi32>
      %188 = arith.addi %181, %187 : vector<2x1x1xi32>
      %c1_i32_67 = arith.constant 1 : i32
      %189 = vector.broadcast %c1_i32_67 : i32 to vector<2x1x1xi32>
      %190 = arith.andi %185, %189 : vector<2x1x1xi32>
      %191 = arith.addi %188, %190 : vector<2x1x1xi32>
      %192 = vector.broadcast %191 : vector<2x1x1xi32> to vector<2x1x256xi32>
      %193 = arith.cmpi sge, %45, %192 : vector<2x1x256xi32>
      %c1_i32_68 = arith.constant 1 : i32
      %c0_i32_69 = arith.constant 0 : i32
      %194 = vector.broadcast %c1_i32_68 : i32 to vector<2x1x256xi32>
      %195 = vector.broadcast %c0_i32_69 : i32 to vector<2x1x256xi32>
      %196 = arith.select %193, %194, %195 : vector<2x1x256xi1>, vector<2x1x256xi32>
      %cst_70 = arith.constant dense<0> : vector<2x1xi32>
      %197 = vector.multi_reduction <add>, %196, %cst_70 [2] : vector<2x1x256xi32> to vector<2x1xi32>
      %198 = vector.shape_cast %197 : vector<2x1xi32> to vector<2x1x1xi32>
      %199 = arith.cmpi sge, %198, %40 : vector<2x1x1xi32>
      %200 = arith.select %199, %191, %181 : vector<2x1x1xi1>, vector<2x1x1xi32>
      %c1_i32_71 = arith.constant 1 : i32
      %201 = vector.broadcast %c1_i32_71 : i32 to vector<2x1x1xi32>
      %202 = arith.subi %191, %201 : vector<2x1x1xi32>
      %203 = arith.select %199, %184, %202 : vector<2x1x1xi1>, vector<2x1x1xi32>
      %204 = arith.subi %203, %200 : vector<2x1x1xi32>
      %c1_i32_72 = arith.constant 1 : i32
      %205 = vector.broadcast %c1_i32_72 : i32 to vector<2x1x1xi32>
      %206 = arith.shrsi %204, %205 : vector<2x1x1xi32>
      %207 = arith.addi %200, %206 : vector<2x1x1xi32>
      %c1_i32_73 = arith.constant 1 : i32
      %208 = vector.broadcast %c1_i32_73 : i32 to vector<2x1x1xi32>
      %209 = arith.andi %204, %208 : vector<2x1x1xi32>
      %210 = arith.addi %207, %209 : vector<2x1x1xi32>
      %211 = vector.broadcast %210 : vector<2x1x1xi32> to vector<2x1x256xi32>
      %212 = arith.cmpi sge, %45, %211 : vector<2x1x256xi32>
      %c1_i32_74 = arith.constant 1 : i32
      %c0_i32_75 = arith.constant 0 : i32
      %213 = vector.broadcast %c1_i32_74 : i32 to vector<2x1x256xi32>
      %214 = vector.broadcast %c0_i32_75 : i32 to vector<2x1x256xi32>
      %215 = arith.select %212, %213, %214 : vector<2x1x256xi1>, vector<2x1x256xi32>
      %cst_76 = arith.constant dense<0> : vector<2x1xi32>
      %216 = vector.multi_reduction <add>, %215, %cst_76 [2] : vector<2x1x256xi32> to vector<2x1xi32>
      %217 = vector.shape_cast %216 : vector<2x1xi32> to vector<2x1x1xi32>
      %218 = arith.cmpi sge, %217, %40 : vector<2x1x1xi32>
      %219 = arith.select %218, %210, %200 : vector<2x1x1xi1>, vector<2x1x1xi32>
      %c1_i32_77 = arith.constant 1 : i32
      %220 = vector.broadcast %c1_i32_77 : i32 to vector<2x1x1xi32>
      %221 = arith.subi %210, %220 : vector<2x1x1xi32>
      %222 = arith.select %218, %203, %221 : vector<2x1x1xi1>, vector<2x1x1xi32>
      scf.yield %219, %222 : vector<2x1x1xi32>, vector<2x1x1xi32>
    }
    %50 = vector.broadcast %49#0 : vector<2x1x1xi32> to vector<2x1x256xi32>
    %51 = arith.cmpi sge, %45, %50 : vector<2x1x256xi32>
    %52 = arith.ori %33, %51 : vector<2x1x256xi1>
    %cst_21 = arith.constant 0.000000e+00 : f32
    %53 = vector.broadcast %cst_21 : f32 to vector<2x1x256xf32>
    %54 = arith.select %52, %31, %53 : vector<2x1x256xi1>, vector<2x1x256xf32>
    %55 = vector.shape_cast %54 : vector<2x1x256xf32> to vector<1x2x1x256xf32>
    %cst_22 = arith.constant dense<0.000000e+00> : vector<1xf32>
    %56 = vector.multi_reduction <add>, %55, %cst_22 [1, 2, 3] : vector<1x2x1x256xf32> to vector<1xf32>
    %57 = vector.shape_cast %56 : vector<1xf32> to vector<1x1x1x1xf32>
    %58 = vector.extract %57[0, 0, 0, 0] : f32 from vector<1x1x1x1xf32>
    %c0_23 = arith.constant 0 : index
    %c0_24 = arith.constant 0 : index
    %c0_25 = arith.constant 0 : index
    %59 = vector.load %arg3[%c0_23, %c0_24, %c0_25] : memref<2x4x256xf32, #tpu.memory_space<vmem>>, vector<2x4x256xf32>
    %c0_26 = arith.constant 0 : index
    %c0_27 = arith.constant 0 : index
    %c0_28 = arith.constant 0 : index
    %60 = vector.load %arg4[%c0_26, %c0_27, %c0_28] : memref<2x4x256xf32, #tpu.memory_space<vmem>>, vector<2x4x256xf32>
    %c0_29 = arith.constant 0 : index
    %c0_30 = arith.constant 0 : index
    %c0_31 = arith.constant 0 : index
    %61 = vector.load %arg5[%c0_29, %c0_30, %c0_31] : memref<1x6x256xf32, #tpu.memory_space<vmem>>, vector<1x6x256xf32>
    %62 = vector.extract_strided_slice %61 {offsets = [0, 0, 0], sizes = [1, 2, 256], strides = [1, 1, 1]} : vector<1x6x256xf32> to vector<1x2x256xf32>
    %63 = vector.extract_strided_slice %61 {offsets = [0, 2, 0], sizes = [1, 2, 256], strides = [1, 1, 1]} : vector<1x6x256xf32> to vector<1x2x256xf32>
    %64 = vector.extract_strided_slice %61 {offsets = [0, 4, 0], sizes = [1, 2, 256], strides = [1, 1, 1]} : vector<1x6x256xf32> to vector<1x2x256xf32>
    %65 = vector.extract_strided_slice %60 {offsets = [0, 0, 0], sizes = [2, 2, 256], strides = [1, 1, 1]} : vector<2x4x256xf32> to vector<2x2x256xf32>
    %66 = vector.broadcast %62 : vector<1x2x256xf32> to vector<2x2x256xf32>
    %67 = arith.subf %65, %66 : vector<2x2x256xf32>
    %cst_32 = arith.constant 1.000000e+01 : f32
    %68 = vector.broadcast %cst_32 : f32 to vector<2x2x256xf32>
    %69 = arith.mulf %68, %67 : vector<2x2x256xf32>
    %70 = vector.broadcast %63 : vector<1x2x256xf32> to vector<2x2x256xf32>
    %71 = arith.mulf %69, %70 : vector<2x2x256xf32>
    %72 = vector.extract_strided_slice %60 {offsets = [0, 2, 0], sizes = [2, 2, 256], strides = [1, 1, 1]} : vector<2x4x256xf32> to vector<2x2x256xf32>
    %73 = math.log %72 : vector<2x2x256xf32>
    %74 = vector.broadcast %64 : vector<1x2x256xf32> to vector<2x2x256xf32>
    %75 = arith.subf %73, %74 : vector<2x2x256xf32>
    %cst_33 = arith.constant 5.000000e+00 : f32
    %76 = vector.broadcast %cst_33 : f32 to vector<2x2x256xf32>
    %77 = arith.mulf %76, %75 : vector<2x2x256xf32>
    %78 = vector.extract_strided_slice %59 {offsets = [0, 0, 0], sizes = [2, 2, 256], strides = [1, 1, 1]} : vector<2x4x256xf32> to vector<2x2x256xf32>
    %79 = arith.subf %78, %71 : vector<2x2x256xf32>
    %80 = math.absf %79 : vector<2x2x256xf32>
    %cst_34 = arith.constant 1.000000e+00 : f32
    %81 = vector.broadcast %cst_34 : f32 to vector<2x2x256xf32>
    %82 = arith.cmpf olt, %80, %81 : vector<2x2x256xf32>
    %cst_35 = arith.constant 5.000000e-01 : f32
    %83 = vector.broadcast %cst_35 : f32 to vector<2x2x256xf32>
    %84 = arith.mulf %83, %79 : vector<2x2x256xf32>
    %85 = arith.mulf %84, %79 : vector<2x2x256xf32>
    %cst_36 = arith.constant 5.000000e-01 : f32
    %86 = vector.broadcast %cst_36 : f32 to vector<2x2x256xf32>
    %87 = arith.subf %80, %86 : vector<2x2x256xf32>
    %88 = arith.select %82, %85, %87 : vector<2x2x256xi1>, vector<2x2x256xf32>
    %89 = vector.extract_strided_slice %59 {offsets = [0, 2, 0], sizes = [2, 2, 256], strides = [1, 1, 1]} : vector<2x4x256xf32> to vector<2x2x256xf32>
    %90 = arith.subf %89, %77 : vector<2x2x256xf32>
    %91 = math.absf %90 : vector<2x2x256xf32>
    %cst_37 = arith.constant 1.000000e+00 : f32
    %92 = vector.broadcast %cst_37 : f32 to vector<2x2x256xf32>
    %93 = arith.cmpf olt, %91, %92 : vector<2x2x256xf32>
    %cst_38 = arith.constant 5.000000e-01 : f32
    %94 = vector.broadcast %cst_38 : f32 to vector<2x2x256xf32>
    %95 = arith.mulf %94, %90 : vector<2x2x256xf32>
    %96 = arith.mulf %95, %90 : vector<2x2x256xf32>
    %cst_39 = arith.constant 5.000000e-01 : f32
    %97 = vector.broadcast %cst_39 : f32 to vector<2x2x256xf32>
    %98 = arith.subf %91, %97 : vector<2x2x256xf32>
    %99 = arith.select %93, %96, %98 : vector<2x2x256xi1>, vector<2x2x256xf32>
    %cst_40 = arith.constant 0.000000e+00 : f32
    %100 = vector.shape_cast %33 : vector<2x1x256xi1> to vector<2x1x256xi1>
    %101 = vector.broadcast %100 : vector<2x1x256xi1> to vector<2x2x256xi1>
    %102 = vector.broadcast %cst_40 : f32 to vector<2x2x256xf32>
    %103 = arith.select %101, %88, %102 : vector<2x2x256xi1>, vector<2x2x256xf32>
    %104 = vector.shape_cast %103 : vector<2x2x256xf32> to vector<1x2x2x256xf32>
    %cst_41 = arith.constant dense<0.000000e+00> : vector<1xf32>
    %105 = vector.multi_reduction <add>, %104, %cst_41 [1, 2, 3] : vector<1x2x2x256xf32> to vector<1xf32>
    %106 = vector.shape_cast %105 : vector<1xf32> to vector<1x1x1x1xf32>
    %107 = vector.extract %106[0, 0, 0, 0] : f32 from vector<1x1x1x1xf32>
    %cst_42 = arith.constant 0.000000e+00 : f32
    %108 = vector.shape_cast %33 : vector<2x1x256xi1> to vector<2x1x256xi1>
    %109 = vector.broadcast %108 : vector<2x1x256xi1> to vector<2x2x256xi1>
    %110 = vector.broadcast %cst_42 : f32 to vector<2x2x256xf32>
    %111 = arith.select %109, %99, %110 : vector<2x2x256xi1>, vector<2x2x256xf32>
    %112 = vector.shape_cast %111 : vector<2x2x256xf32> to vector<1x2x2x256xf32>
    %cst_43 = arith.constant dense<0.000000e+00> : vector<1xf32>
    %113 = vector.multi_reduction <add>, %112, %cst_43 [1, 2, 3] : vector<1x2x2x256xf32> to vector<1xf32>
    %114 = vector.shape_cast %113 : vector<1xf32> to vector<1x1x1x1xf32>
    %115 = vector.extract %114[0, 0, 0, 0] : f32 from vector<1x1x1x1xf32>
    %116 = arith.addf %107, %115 : f32
    %117 = vector.shape_cast %38 : vector<2x1x1xi32> to vector<1x2x1x1xi32>
    %cst_44 = arith.constant dense<0> : vector<1xi32>
    %118 = vector.multi_reduction <add>, %117, %cst_44 [1, 2, 3] : vector<1x2x1x1xi32> to vector<1xi32>
    %119 = vector.shape_cast %118 : vector<1xi32> to vector<1x1x1x1xi32>
    %120 = vector.extract %119[0, 0, 0, 0] : i32 from vector<1x1x1x1xi32>
    %121 = arith.sitofp %120 : i32 to f32
    %122 = tpu.iota {dimensions = array<i32: 1>} : vector<1x8x128xi32>
    %123 = tpu.iota {dimensions = array<i32: 2>} : vector<1x8x128xi32>
    %c0_i32_45 = arith.constant 0 : i32
    %124 = vector.broadcast %c0_i32_45 : i32 to vector<1x8x128xi32>
    %125 = arith.cmpi eq, %122, %124 : vector<1x8x128xi32>
    %c0_i32_46 = arith.constant 0 : i32
    %126 = vector.broadcast %c0_i32_46 : i32 to vector<1x8x128xi32>
    %127 = arith.cmpi eq, %123, %126 : vector<1x8x128xi32>
    %128 = arith.andi %125, %127 : vector<1x8x128xi1>
    %cst_47 = arith.constant 0.000000e+00 : f32
    %129 = vector.broadcast %116 : f32 to vector<1x8x128xf32>
    %130 = vector.broadcast %cst_47 : f32 to vector<1x8x128xf32>
    %131 = arith.select %128, %129, %130 : vector<1x8x128xi1>, vector<1x8x128xf32>
    %c0_i32_48 = arith.constant 0 : i32
    %132 = vector.broadcast %c0_i32_48 : i32 to vector<1x8x128xi32>
    %133 = arith.cmpi eq, %122, %132 : vector<1x8x128xi32>
    %c1_i32_49 = arith.constant 1 : i32
    %134 = vector.broadcast %c1_i32_49 : i32 to vector<1x8x128xi32>
    %135 = arith.cmpi eq, %123, %134 : vector<1x8x128xi32>
    %136 = arith.andi %133, %135 : vector<1x8x128xi1>
    %137 = vector.broadcast %58 : f32 to vector<1x8x128xf32>
    %138 = arith.select %136, %137, %131 : vector<1x8x128xi1>, vector<1x8x128xf32>
    %c0_i32_50 = arith.constant 0 : i32
    %139 = vector.broadcast %c0_i32_50 : i32 to vector<1x8x128xi32>
    %140 = arith.cmpi eq, %122, %139 : vector<1x8x128xi32>
    %c2_i32 = arith.constant 2 : i32
    %141 = vector.broadcast %c2_i32 : i32 to vector<1x8x128xi32>
    %142 = arith.cmpi eq, %123, %141 : vector<1x8x128xi32>
    %143 = arith.andi %140, %142 : vector<1x8x128xi1>
    %144 = vector.broadcast %121 : f32 to vector<1x8x128xf32>
    %145 = arith.select %143, %144, %138 : vector<1x8x128xi1>, vector<1x8x128xf32>
    %c0_51 = arith.constant 0 : index
    %c0_52 = arith.constant 0 : index
    %c0_53 = arith.constant 0 : index
    %146 = vector.load %arg6[%c0_51, %c0_52, %c0_53] : memref<1x8x128xf32, #tpu.memory_space<vmem>>, vector<1x8x128xf32>
    tpu.vector_store %arg6[%c0_51, %c0_52, %c0_53], %145 {strides = array<i32>} : memref<1x8x128xf32, #tpu.memory_space<vmem>>, vector<1x8x128xf32>,
    return
  }
  func.func @transform_0(%arg0: i32) -> (i32, i32, i32) {
    %c0_i32 = arith.constant 0 : i32
    %c0_i32_0 = arith.constant 0 : i32
    %c0_i32_1 = arith.constant 0 : i32
    return %arg0, %c0_i32, %c0_i32_0 : i32, i32, i32
  }
  func.func @transform_1(%arg0: i32) -> (i32, i32, i32) {
    %c0_i32 = arith.constant 0 : i32
    %c0_i32_0 = arith.constant 0 : i32
    %c0_i32_1 = arith.constant 0 : i32
    return %arg0, %c0_i32, %c0_i32_0 : i32, i32, i32
  }
  func.func @transform_2(%arg0: i32) -> (i32, i32, i32) {
    %c0_i32 = arith.constant 0 : i32
    %c0_i32_0 = arith.constant 0 : i32
    %c0_i32_1 = arith.constant 0 : i32
    return %arg0, %c0_i32, %c0_i32_0 : i32, i32, i32
  }
  func.func @transform_3(%arg0: i32) -> (i32, i32, i32) {
    %c0_i32 = arith.constant 0 : i32
    %c0_i32_0 = arith.constant 0 : i32
    %c0_i32_1 = arith.constant 0 : i32
    return %arg0, %c0_i32, %c0_i32_0 : i32, i32, i32
  }
  func.func @transform_4(%arg0: i32) -> (i32, i32, i32) {
    %c0_i32 = arith.constant 0 : i32
    %c0_i32_0 = arith.constant 0 : i32
    %c0_i32_1 = arith.constant 0 : i32
    %c0_i32_2 = arith.constant 0 : i32
    return %c0_i32, %c0_i32_0, %c0_i32_1 : i32, i32, i32
  }
  func.func @transform_5(%arg0: i32) -> (i32, i32, i32) {
    %c0_i32 = arith.constant 0 : i32
    %c0_i32_0 = arith.constant 0 : i32
    %c0_i32_1 = arith.constant 0 : i32
    return %arg0, %c0_i32, %c0_i32_0 : i32, i32, i32
  }
}

</mosaic_0001>

<bundles_post_ra>
// kernel: tpu_custom_call.1
= control target key start
LH: loop header
LB: loop body
LE: loop exit
PB: predicated region body
PF: predicated region fallthrough
CT: control target
= control target key end

     0   :  { %s2139_s0 = inlined_call_operand.hbm [shape: f32[4,8,256], index: 0, kind: input, shape index: {}]   ;;  %s2140_s1 = inlined_call_operand.vmem [shape: s32[4,1,256], index: 1, kind: input, shape index: {}]   ;;  %s2141_s2 = inlined_call_operand.hbm [shape: f32[4,4,256], index: 2, kind: input, shape index: {}]   ;;  %s2142_s3 = inlined_call_operand.hbm [shape: f32[4,4,256], index: 3, kind: input, shape index: {}]   ;;  %s2143_s4 = inlined_call_operand.vmem [shape: f32[1,6,256], index: 4, kind: input, shape index: {}]   ;;  %s2144_s5 = inlined_call_operand.hbm [shape: f32[2,8,128], index: 5, kind: output, shape index: {}]  }
   0x1   :  { %2152 = sst [smem:[#allocation16_spill]] %s2141_s2 }
   0x2   :  { %10 = vsyncpa [#allocation3], 0 }
   0x3   :  { %12 = vsyncpa [#allocation3 + $0x1], 0 }
   0x4   :  { %13 = vsyncpa [#allocation6], 0 }
   0x5   :  { %15 = vsyncpa [#allocation6 + $0x1], 0 }
   0x6   :  { %16 = vsyncpa [#allocation4], 0 }
   0x7   :  { %18 = vsyncpa [#allocation4 + $0x1], 0  ;;  %s1607_s18 = smov 0   ;;  %s1609_s19 = smov 0  }
   0x8   :  { %s1611_s20 = smov 0   ;;  %s1613_s21 = smov 0  }
   0x9 LB: > { %2153 = sst [smem:[#allocation12_spill]] %s1545_s20  ;;  %s1628_s22 = sadd.s32 4294967295, %s1549_s21   ;;  %s1549_s21 = sphi %s1613_s21, %s2182_s21   ;;  %s1545_s20 = sphi %s1611_s20, %s2184_s20   ;;  %s1541_s19 = sphi %s1609_s19, %s2186_s19   ;;  %s1537_s18 = sphi %s1607_s18, %s2185_s18  }
   0xa   : > { %2154 = sst [smem:[#allocation13_spill]] %s1549_s21  ;;  %s1186_s23 = sadd.s32 4294967294, %s1549_s21  }
   0xb   : > { %s1632_s24 = sadd.s32 1, %s1549_s21   ;;  %s31_s25 = sadd.s32 1, %s1545_s20 }
   0xc   : > { %2155 = sst [smem:[#allocation14_spill]] %s1632_s24  ;;  %s28_s26 = ssub.s32 %s1549_s21, %s1632_s24 }
   0xd   : > { %p38_p0 = scmp.ne.s32.totalorder %s1545_s20, %s1541_s19  ;;  %p29_p1 = scmp.eq.s32.totalorder %s28_s26, 0 }
   0xe   : > { %p39_p2 = scmp.eq.s32.totalorder %s1549_s21, 0  ;;  %p44_p3 = scmp.ne.s32.totalorder %s1541_s19, %s1537_s18 }
   0xf   : > { %p45_p4 = scmp.eq.s32.totalorder %s1628_s22, 0  ;;  %p167_p7 = scmp.eq.s32.totalorder %s1628_s22, 1 }
  0x10   : > { %s1644_s27 = scalar_select %p29_p1, %s1545_s20, %s31_s25  }
  0x11   : > { %p40_p5 = por %p39_p2, %p38_p0  ;;  %p1646_p6 = por %p45_p4, %p44_p3 }
  0x12   : > { %2156 = sst [smem:[#allocation15_spill]] %s1644_s27  ;;  %p173_p8 = scmp.eq.s32.totalorder %s1186_s23, 1 }
  0x13   : > { %p1261_p10 = scmp.lt.s32.totalorder %s1549_s21, 2  ;;  %p1653_p11 = por %p167_p7, %p38_p0 }
  0x14   : > { %p1657_p12 = por %p173_p8, %p44_p3  ;;  %s1662_s6 = sand.u32 1, %s1545_s20  }
  0x15   : > { %p1664_p13 = pnand %p1261_p10, %p40_p5  ;;  %s228_s8 = sand.u32 1, %s1549_s21  }
  0x16   : > { %s2145_s9 = sshll.u32 %s1662_s6, 4  ;;  %s1228_s10 = sshll.u32 %s1549_s21, 4 }
  0x17   : > { %s2161_s2 = sld [smem:[#allocation16_spill]]  ;;  %s232_s14 = scalar_lea.vmem [#allocation5], %s2145_s9 }
  0x18   : > { %s241_s15 = sshll.u32 %s232_s14, 4  ;;  %s1676_s17 = scalar_lea.sflag [#allocation6], %s228_s8  ;;  %s242_s15 = int_to_ptr.vmem [resolvable:$true] %s241_s15 }
  0x19   : > { %p1373_p1 = pneg %p1664_p13 }
  0x1d   : > { %s238_s13 = scalar_lea.hbm %s2161_s2, %s1228_s10  ;;  %s1376_s12 = scalar_lea.hbm %s2161_s2, 32 }
  0x1e   : > { %s239_s16 = sshll.u32 %s238_s13, 4  ;;  %s240_s16 = int_to_ptr.hbm [resolvable:$true] %s239_s16 }
  0x1f   : > { %s1369_s23 = sshra.s32 %s240_s16, 4  ;;  %s1370_s23 = int_to_ptr.hbm [resolvable:$true] %s1369_s23 }
  0x20   : > { %s1371_s25 = scalar_lea.hbm %s1370_s23, 16  ;;  %p1377_p4 = scmp.lt.s32.totalorder %s1370_s23, %s2161_s2 }
  0x21   : > { %p1372_p0 = scmp.ne.s32.totalorder %s1370_s23, %s1371_s25  ;;  %p1378_p5 = scmp.lt.s32.totalorder %s1376_s12, %s1371_s25 }
  0x23   : > { %p1374_p2 = pnand %p1373_p1, %p1372_p0  ;;  %p1379_p7 = por %p1378_p5, %p1377_p4 }
  0x25   : > { %p1375_p3 = pneg %p1374_p2 }
  0x27   : > { %p1380_p8 = pnand %p1379_p7, %p1375_p3 }
  0x29   : > { %1383 = shalt.err (!%p1380_p8)
}
  0x2a   : > { %s2146_s8 = smov 128   ;;  %s2147_s9 = smov 8  }
  0x2b   : > { %1253 = dma.hbm_to_vmem [thread:$0]  (!%p1664_p13), %s240_s16, 256, %s242_s15, %s1676_s17, %s2146_s8, %s2146_s8, %s2147_s9  }
  0x2c   : > { %s261_s25 = scalar_lea.hbm %s2142_s3, %s1228_s10  ;;  %s2162_s11 = sshll.u32 %s1662_s6, 4 }
  0x2d   : > { %s255_s12 = scalar_lea.vmem [#allocation7], %s2162_s11  ;;  %s262_s13 = sshll.u32 %s261_s25, 4  ;;  %s1702_s13 = int_to_ptr.hbm [resolvable:$true] %s262_s13 }
  0x2e   : > { %s264_s14 = sshll.u32 %s255_s12, 4  ;;  %p1201_p10 = scmp.ge.s32.totalorder %s1549_s21, 1  ;;  %s1700_s14 = int_to_ptr.vmem [resolvable:$true] %s264_s14 }
  0x2f   : > { %p272_p0 = scmp.lt.s32.totalorder %s1549_s21, 3  ;;  %s1189_s2 = sshll.u32 %s1662_s6, 5 }
  0x30   : > { %s1226_s27 = sshll.u32 %s1549_s21, 5  ;;  %s200_s23 = scalar_lea.vmem [#allocation2], %s1189_s2 }
  0x31   : > { %p1708_p2 = pnand %p1201_p10, %p272_p0  ;;  %s206_s26 = scalar_lea.hbm %s2139_s0, %s1226_s27 }
  0x32   : > { %s209_s11 = sshll.u32 %s200_s23, 4  ;;  %s207_s25 = sshll.u32 %s206_s26, 4  ;;  %s210_s11 = int_to_ptr.vmem [resolvable:$true] %s209_s11  ;;  %s208_s25 = int_to_ptr.hbm [resolvable:$true] %s207_s25 }
  0x33   : > { %s197_s12 = scalar_lea.sflag [#allocation3], %s1662_s6  ;;  %s1399_s8 = sshra.s32 %s208_s25, 4  ;;  %s1400_s8 = int_to_ptr.hbm [resolvable:$true] %s1399_s8 }
  0x34   : > { %s1401_s9 = scalar_lea.hbm %s1400_s8, 32  ;;  %s1406_s21 = scalar_lea.hbm %s2139_s0, 64 }
  0x35   : > { %p1402_p3 = scmp.ne.s32.totalorder %s1400_s8, %s1401_s9  ;;  %p1407_p7 = scmp.lt.s32.totalorder %s1400_s8, %s2139_s0 }
  0x36   : > { %p1408_p8 = scmp.lt.s32.totalorder %s1406_s21, %s1401_s9 }
  0x37   : > { %p1404_p4 = pnand %p1402_p3, %p1373_p1 }
  0x38   : > { %p1409_p10 = por %p1408_p8, %p1407_p7 }
  0x39   : > { %p1405_p5 = pneg %p1404_p4 }
  0x3b   : > { %p1410_p0 = pnand %p1409_p10, %p1405_p5 }
  0x3d   : > { %1413 = shalt.err (!%p1410_p0)
}
  0x3e   : > { %s1573_s2 = smov 256   ;;  %s1574_s6 = smov 16  }
  0x3f   : > { %1250 = dma.hbm_to_vmem [thread:$0]  (!%p1664_p13), %s208_s25, 512, %s210_s11, %s197_s12, %s1573_s2, %s1573_s2, %s1574_s6  }
  0x40   : > { %s1429_s10 = sshra.s32 %s1702_s13, 4  ;;  %s1436_s24 = scalar_lea.hbm %s2142_s3, 32  ;;  %s1430_s10 = int_to_ptr.hbm [resolvable:$true] %s1429_s10 }
  0x41   : > { %s1431_s26 = scalar_lea.hbm %s1430_s10, 16  ;;  %p1437_p5 = scmp.lt.s32.totalorder %s1430_s10, %s2142_s3 }
  0x42   : > { %p1432_p3 = scmp.ne.s32.totalorder %s1430_s10, %s1431_s26  ;;  %p1438_p7 = scmp.lt.s32.totalorder %s1436_s24, %s1431_s26 }
  0x44   : > { %p1434_p4 = pnand %p1432_p3, %p1373_p1  ;;  %p1439_p8 = por %p1438_p7, %p1437_p5 }
  0x46   : > { %p1435_p9 = pneg %p1434_p4 }
  0x48   : > { %p1440_p10 = pnand %p1439_p8, %p1435_p9 }
  0x4a   : > { %1443 = shalt.err (!%p1440_p10)
}
  0x4b   : > { %s2164_s23 = smov 8   ;;  %s2165_s11 = smov 128  }
  0x4c   : > { %1256 = dma.hbm_to_vmem [thread:$0]  (!%p1664_p13), %s1702_s13, 256, %s1700_s14, %s1676_s17, %s2165_s11, %s2165_s11, %s2164_s23  }
  0x4d   : > { %276 = sbr.rel (%p1708_p2) target bundleno = 1054 (0x41e), region = 40  ;;  %s1748_s25 = sand.u32 (!%p1708_p2), 1, %s1541_s19  }
  0x4e   : > { %s1202_s12 = sshll.u32 (!%p1708_p2), %s1748_s25, 5  ;;  %s279_s16 = scalar_lea.sflag (!%p1708_p2), [#allocation3], %s1748_s25 }
  0x4f   : > { %s1752_s27 = scalar_lea.vmem (!%p1708_p2), [#allocation2], %s1202_s12 }
  0x52   : > { %1524 = dma.done.wait (%p1646_p6), %s279_s16, 512  }
  0x53   : > { %1526 = vsyncadd (%p1646_p6), %s279_s16, 4294966784  ;;  %s288_s7 = sand.u32 1, %s1628_s22   ;;  %s1203_s17 = sshll.u32 %s1748_s25, 4 }
  0x54   : > { %s289_s14 = scalar_lea.sflag [#allocation6], %s288_s7  ;;  %s1762_s13 = scalar_lea.vmem [#allocation5], %s1203_s17 }
  0x55   : > { %1528 = dma.done.wait (%p1646_p6), %s289_s14, 512  }
  0x56   : > { %1530 = vsyncadd (%p1646_p6), %s289_s14, 4294966784  ;;  %s1206_s15 = sshll.u32 %s1628_s22, 1  ;;  %v1775_v1 = vld [vmem:[%s1752_s27] sm:$0xff]  ;;  %v1778_v2 = vld [vmem:[%s1752_s27 + $0x8] sm:$0xff]  ;;  %v1575_v6 = vmov 0   ;;  %vm523_vm1 = vcmask 1040384   ;;  %v360_v43 = vlaneseq }
  0x57   : > { %p347_p9 = scmp.lt.s32.totalorder %s1206_s15, 3  ;;  %v362_v3 = vrot.slane %v1775_v1, 4  ;;  %v368_v4 = vrot.slane %v1778_v2, 4  ;;  %s1205_s28 = sshll.u32 %s1748_s25, 3  ;;  %v1829_v53 = vld [vmem:[%s1752_s27 + $0x10] sm:$0xff]  ;;  %v1832_v54 = vld [vmem:[%s1752_s27 + $0x18] sm:$0xff] }
  0x58   : > { %v1824_v47 = vshrl.u32 %v360_v43, 7  ;;  %v374_v56 = vrot.slane %v1829_v53, 4  ;;  %v380_v57 = vrot.slane %v1832_v54, 4  ;;  %s1914_s20 = scalar_lea.vmem [#allocation7], %s1203_s17  ;;  %s1918_s21 = scalar_lea.vmem [#allocation8], %s1205_s28 }
  0x59   : > { %s2188_s15 = smov (!%p347_p9, %s1206_s15), 3  ;;  %v363_v8 = vmax.f32 %v1775_v1, %v362_v3  ;;  %v369_v9 = vmax.f32 %v1778_v2, %v368_v4  ;;  %s1928_s24 = smov 0  }
  0x5a   : > { %s1207_s2 = sshll.u32 %s2188_s15, 1  ;;  %v375_v62 = vmax.f32 %v1829_v53, %v374_v56 }
  0x5b   : > { %s350_s26 = scalar_lea.vmem %s2140_s1, %s1207_s2  ;;  %v364_v13 = vrot.slane %v363_v8, 2  ;;  %v370_v14 = vrot.slane %v369_v9, 2 }
  0x5c   : > { %v1772_v0 = vld [vmem:[%s350_s26] sm:$0x3]  ;;  %v1783_v5 = vld [vmem:[%s350_s26 + $0x2] sm:$0x3] }
  0x5d   : > { %vm515_vm0 = vcmp.gt.s32.totalorder %v1772_v0, 0  ;;  %vm516_vm2 = vcmp.gt.s32.totalorder %v1783_v5, 0  ;;  %v365_v20 = vmax.f32 %v363_v8, %v364_v13  ;;  %v371_v21 = vmax.f32 %v369_v9, %v370_v14 }
  0x5e   : > { %v1787_v7 = vsel %vm515_vm0, 1, %v1575_v6  ;;  %v1796_v12 = vsel %vm516_vm2, 1, %v1575_v6  ;;  %v442_v51 = vperm.slane %v1772_v0, 0  ;;  %v443_v52 = vperm.slane %v1772_v0, 1 }
  0x5f   : > { %v519_v10 = vperm.slane %v1787_v7, 0  ;;  %v520_v11 = vperm.slane %v1787_v7, 1  ;;  %v521_v18 = vperm.slane %v1796_v12, 0  ;;  %v522_v19 = vperm.slane %v1796_v12, 1 }
  0x60   : > { %v366_v26 = vrot.slane %v365_v20, 1  ;;  %v372_v27 = vrot.slane %v371_v21, 1  ;;  %vm446_vm3 = vcmp.eq.s32.totalorder %v1824_v47, %v442_v51  ;;  %vm447_vm4 = vcmp.eq.s32.totalorder %v1824_v47, %v443_v52 }
  0x61   : > { %v524_v15 = vsel %vm523_vm1, %v519_v10, 0  ;;  %v525_v16 = vsel %vm523_vm1, %v520_v11, 0  ;;  %v539_v24 = vsel %vm523_vm1, %v521_v18, 0  ;;  %v540_v25 = vsel %vm523_vm1, %v522_v19, 0 }
  0x62   : > { %v526_v17 = vadd.s32 %v525_v16, %v524_v15  ;;  %v541_v28 = vadd.s32 %v540_v25, %v539_v24  ;;  %v1812_v31 = vmax.f32 %v365_v20, %v366_v26  ;;  %v1814_v32 = vmax.f32 %v371_v21, %v372_v27 }
  0x63   : > { %v450_v60 = vsel %vm446_vm3, %v1775_v1, 0.0  ;;  %v451_v61 = vsel %vm447_vm4, %v1778_v2, 0.0  ;;  %v381_v8 = vmax.f32 %v1832_v54, %v380_v57  ;;  %v376_v14 = vrot.slane %v375_v62, 2 }
  0x64   : > { %v528_v22 = vshrl.u32 %v526_v17, 16  ;;  %v527_v23 = vand.u32 65535, %v526_v17  ;;  %v543_v33 = vshrl.u32 %v541_v28, 16  ;;  %v542_v34 = vand.u32 65535, %v541_v28 }
  0x65   : > { %v402_v35 = vsub.f32 %v1775_v1, %v1812_v31  ;;  %v403_v36 = vsub.f32 %v1778_v2, %v1814_v32  ;;  %v386_v41 = vsub.f32 -inf, %v1812_v31  ;;  %v387_v42 = vsub.f32 -inf, %v1814_v32 }
  0x66   : > { %v530_v29 = vcvt.s32.f32 %v528_v22  ;;  %v529_v30 = vcvt.s32.f32 %v527_v23  ;;  %v545_v39 = vcvt.s32.f32 %v543_v33  ;;  %v544_v40 = vcvt.s32.f32 %v542_v34 }
  0x67   : > { %v406_v37 = vmul.f32 1.442695, %v402_v35  ;;  %v408_v38 = vmul.f32 1.442695, %v403_v36  ;;  %v390_v44 = vmul.f32 1.442695, %v386_v41  ;;  %v377_v1 = vmax.f32 %v375_v62, %v376_v14 }
  0x68   : > { %533 = vadd.xlane.f32.xlu0 %v530_v29  ;;  %531 = vadd.xlane.f32.xlu1 %v529_v30  ;;  %v392_v45 = vmul.f32 1.442695, %v387_v42  ;;  %v454_v4 = vrot.slane %v450_v60, 4  ;;  %v460_v6 = vrot.slane %v451_v61, 4  ;;  %v382_v20 = vrot.slane %v381_v8, 2 }
  0x69   : > { %1341 = vpow2.f32 %v406_v37  ;;  %v378_v28 = vrot.slane %v377_v1, 1  ;;  %v494_v42 = vld [vmem:[%s1752_s27] ss:$8 sm:$0x3]  ;;  %v445_v51 = vperm.slane %v1783_v5, 1 }
  0x6a   : > { %1343 = vpow2.f32 %v408_v38  ;;  %v455_v16 = vadd.f32 %v454_v4, %v450_v60  ;;  %v461_v17 = vadd.f32 %v460_v6, %v451_v61  ;;  %v383_v25 = vmax.f32 %v381_v8, %v382_v20 }
  0x6b   : > { %1345 = vpow2.f32 %v390_v44  ;;  %v1842_v34 = vmax.f32 %v377_v1, %v378_v28  ;;  %vm449_vm6 = vcmp.eq.s32.totalorder %v1824_v47, %v445_v51 }
  0x6c   : > { %1347 = vpow2.f32 %v392_v45  ;;  %v456_v24 = vrot.slane %v455_v16, 2  ;;  %v462_v27 = vrot.slane %v461_v17, 2  ;;  %v384_v30 = vrot.slane %v383_v25, 1 }
  0x6e   : > { %v457_v36 = vadd.f32 %v456_v24, %v455_v16  ;;  %v1844_v37 = vmax.f32 %v383_v25, %v384_v30  ;;  %v463_v38 = vadd.f32 %v462_v27, %v461_v17 }
  0x6f   : > { %v1342_v46 = vpop.eup %1341 }
  0x70   : > { %548 = vadd.xlane.f32.xlu0 %v545_v39  ;;  %546 = vadd.xlane.f32.xlu1 %v544_v40  ;;  %v1344_v48 = vpop.eup %1343  ;;  %v414_v49 = vrot.slane %v1342_v46, 4  ;;  %v404_v39 = vsub.f32 %v1829_v53, %v1842_v34  ;;  %v405_v40 = vsub.f32 %v1832_v54, %v1844_v37  ;;  %v458_v44 = vrot.slane %v457_v36, 1 }
  0x71   : > { %v420_v50 = vrot.slane %v1344_v48, 4  ;;  %v1346_v63 = vpop.eup %1345  ;;  %v464_v45 = vrot.slane %v463_v38, 1 }
  0x72   : > { %v415_v55 = vadd.f32 %v1342_v46, %v414_v49  ;;  %v1348_v9 = vpop.eup %1347  ;;  %v398_v21 = vmul.f32 0.0, %v1346_v63  ;;  %v410_v41 = vmul.f32 1.442695, %v404_v39  ;;  %v388_v46 = vsub.f32 -inf, %v1842_v34 }
  0x73   : > { %v421_v58 = vadd.f32 %v1344_v48, %v420_v50  ;;  %v399_v23 = vmul.f32 0.0, %v1348_v9  ;;  %v412_v48 = vmul.f32 1.442695, %v405_v40  ;;  %v444_v49 = vperm.slane %v1783_v5, 0 }
  0x74   : > { %v416_v59 = vrot.slane %v415_v55, 2  ;;  %v389_v50 = vsub.f32 -inf, %v1844_v37  ;;  %v1857_v61 = vadd.f32 %v464_v45, %v463_v38  ;;  %v394_v62 = vmul.f32 1.442695, %v388_v46 }
  0x75   : > { %v422_v3 = vrot.slane %v421_v58, 2  ;;  %vm448_vm5 = vcmp.eq.s32.totalorder %v1824_v47, %v444_v49 }
  0x76   : > { %v417_v13 = vadd.f32 %v416_v59, %v415_v55  ;;  %v499_v55 = vperm.slane %v494_v42, 0  ;;  %v1855_v59 = vadd.f32 %v458_v44, %v457_v36  ;;  %v452_v9 = vsel %vm448_vm5, %v1829_v53, 0.0 }
  0x77   : > { %v423_v15 = vadd.f32 %v422_v3, %v421_v58  ;;  %v500_v58 = vperm.slane %v494_v42, 1  ;;  %v396_v3 = vmul.f32 1.442695, %v389_v50 }
  0x78   : > { %v418_v22 = vrot.slane %v417_v13, 1 }
  0x79   : > { %v424_v2 = vrot.slane %v423_v15, 1 }
  0x7a   : > { %v419_v26 = vadd.f32 %v418_v22, %v417_v13  ;;  %v466_v22 = vrot.slane %v452_v9, 4 }
  0x7b   : > { %v425_v29 = vadd.f32 %v424_v2, %v423_v15  ;;  %v453_v15 = vsel %vm449_vm6, %v1832_v54, 0.0 }
  0x7c   : > { %v438_v33 = vadd.f32 %v419_v26, %v398_v21  ;;  %v467_v28 = vadd.f32 %v466_v22, %v452_v9 }
  0x7d   : > { %v439_v35 = vadd.f32 %v425_v29, %v399_v23  ;;  %v472_v23 = vrot.slane %v453_v15, 4 }
  0x7e   : > { %1349 = vlog2.f32 %v438_v33 }
  0x7f   : > { %1351 = vlog2.f32 %v439_v35  ;;  %v473_v33 = vadd.f32 %v472_v23, %v453_v15 }
  0x80   : > { %1353 = vpow2.f32 %v410_v41  ;;  %v468_v41 = vrot.slane %v467_v28, 2 }
  0x81   : > { %1355 = vpow2.f32 %v412_v48  ;;  %v474_v44 = vrot.slane %v473_v33, 2 }
  0x82   : > { %1357 = vpow2.f32 %v394_v62  ;;  %v469_v49 = vadd.f32 %v468_v41, %v467_v28  ;;  %v1926_v41 = vmov 0  }
  0x83   : > { %1359 = vpow2.f32 %v396_v3  ;;  %v475_v50 = vadd.f32 %v474_v44, %v473_v33 }
  0x84   : > { %v1350_v52 = vpop.eup %1349  ;;  %v470_v51 = vrot.slane %v469_v49, 1 }
  0x85   : > { %v1352_v56 = vpop.eup %1351  ;;  %v483_v57 = vmul.f32 0.6931472, %v1350_v52  ;;  %v476_v52 = vrot.slane %v475_v50, 1 }
  0x86   : > { %v485_v60 = vmul.f32 0.6931472, %v1352_v56  ;;  %v1354_v13 = vpop.eup %1353 }
  0x87   : > { %v1861_v63 = vadd.f32 %v483_v57, %v1812_v31  ;;  %v1356_v16 = vpop.eup %1355  ;;  %v1883_v3 = vadd.f32 %v476_v52, %v475_v50 }
  0x88   : > { %v1865_v4 = vadd.f32 %v485_v60, %v1814_v32  ;;  %v426_v32 = vrot.slane %v1354_v13, 4  ;;  %v432_v21 = vrot.slane %v1356_v16, 4  ;;  %v1358_v25 = vpop.eup %1357 }
  0x89   : > { %v507_v6 = vsub.f32 %v1861_v63, %v499_v55  ;;  %v511_v8 = vsub.f32 %v1861_v63, %v1855_v59  ;;  %v1360_v29 = vpop.eup %1359  ;;  %v400_v36 = vmul.f32 0.0, %v1358_v25  ;;  %v1208_v55 = vld [vmem:[%s1752_s27 + $0x10] ss:$8 sm:$0x3] }
  0x8a   : > { %v508_v14 = vsub.f32 %v1865_v4, %v500_v58  ;;  %v512_v31 = vsub.f32 %v1865_v4, %v1857_v61  ;;  %v427_v1 = vadd.f32 %v1354_v13, %v426_v32  ;;  %v433_v53 = vadd.f32 %v1356_v16, %v432_v21 }
  0x8b   : > { %v556_v17 = vmax.f32 %v507_v6, 0.0  ;;  %v401_v39 = vmul.f32 0.0, %v1360_v29  ;;  %v1881_v58 = vadd.f32 %v470_v51, %v469_v49  ;;  %v501_v62 = vperm.slane %v1208_v55, 0 }
  0x8c   : > { %v557_v20 = vmax.f32 %v508_v14, 0.0  ;;  %v428_v24 = vrot.slane %v427_v1, 2  ;;  %v434_v27 = vrot.slane %v433_v53, 2  ;;  %v502_v9 = vperm.slane %v1208_v55, 1 }
  0x8e   : > { %v564_v2 = vrot.slane %v557_v20, 7  ;;  %v429_v30 = vadd.f32 %v428_v24, %v427_v1  ;;  %v435_v35 = vadd.f32 %v434_v27, %v433_v53 }
  0x90   : > { %v566_v26 = vsel %vm523_vm1, %v556_v17, %v564_v2  ;;  %v430_v38 = vrot.slane %v429_v30, 1  ;;  %v436_v40 = vrot.slane %v435_v35, 1 }
  0x91   : > { %v1878_v54 = vsel %vm515_vm0, 4294967295, %v566_v26 }
  0x92   : > { %v431_v42 = vadd.f32 %v430_v38, %v429_v30  ;;  %v437_v45 = vadd.f32 %v436_v40, %v435_v35  ;;  %v1920_v38 = vmov 2147483647   ;;  %v1924_v40 = vmov 0  }
  0x94   : > { %v440_v46 = vadd.f32 %v431_v42, %v400_v36  ;;  %v441_v48 = vadd.f32 %v437_v45, %v401_v39  ;;  %v1922_v39 = vmov 2147483647  }
  0x96   : > { %1361 = vlog2.f32 %v440_v46 }
  0x97   : > { %1363 = vlog2.f32 %v441_v48 }
  0x9c   : > { %v1362_v56 = vpop.eup %1361 }
  0x9d   : > { %v1364_v57 = vpop.eup %1363  ;;  %v487_v60 = vmul.f32 0.6931472, %v1362_v56 }
  0x9e   : > { %v489_v6 = vmul.f32 0.6931472, %v1364_v57 }
  0x9f   : > { %v1886_v13 = vadd.f32 %v487_v60, %v1842_v34 }
  0xa0   : > { %v1889_v14 = vadd.f32 %v489_v6, %v1844_v37 }
  0xa1   : > { %v509_v15 = vsub.f32 %v1886_v13, %v501_v62  ;;  %v513_v16 = vsub.f32 %v1886_v13, %v1881_v58 }
  0xa2   : > { %v510_v32 = vsub.f32 %v1889_v14, %v502_v9  ;;  %v514_v17 = vsub.f32 %v1889_v14, %v1883_v3 }
  0xa3   : > { %v558_v20 = vmax.f32 %v509_v15, 0.0 }
  0xa4   : > { %v559_v21 = vmax.f32 %v510_v32, 0.0 }
  0xa6   : > { %v565_v22 = vrot.slane %v559_v21, 7 }
  0xa8   : > { %v567_v1 = vsel %vm523_vm1, %v558_v20, %v565_v22 }
  0xa9   : > { %v1900_v34 = vsel %vm516_vm2, 4294967295, %v567_v1 }
  0xdb   : > { %v534_v37 = vpop.xlane.xlu0 %533  ;;  %v532_v23 = vpop.xlane.xlu1 %531 }
  0xdc   : > { %v536_v2 = vcvt.f32.s32 %v534_v37  ;;  %v535_v53 = vcvt.f32.s32 %v532_v23 }
  0xde   : > { %v537_v24 = vshll.u32 %v536_v2, 16 }
  0xe0   : > { %v1902_v25 = vadd.s32 %v537_v24, %v535_v53 }
  0xe2   : > { %v1905_v26 = vmul.u32 3, %v1902_v25 }
  0xe3   : > { %v549_v27 = vpop.xlane.xlu0 %548  ;;  %v547_v28 = vpop.xlane.xlu1 %546 }
  0xe4   : > { %v551_v29 = vcvt.f32.s32 %v549_v27  ;;  %v550_v30 = vcvt.f32.s32 %v547_v28 }
  0xe6   : > { %v552_v33 = vshll.u32 %v551_v29, 16 }
  0xe8   : > { %v1907_v35 = vadd.s32 %v552_v33, %v550_v30 }
  0xea   : > { %v1910_v36 = vmul.u32 3, %v1907_v35 }
  0xeb LB: >> { %v580_v42 = vsub.s32 %v1557_v39, %v1565_v41  ;;  %v581_v44 = vsub.s32 %v1553_v38, %v1561_v40  ;;  %v1576_v60 = vmov 0   ;;  %s575_s24 = sadd.s32 1, %s1569_s24   ;;  %s1569_s24 = sphi %s1928_s24, %s575_s24   ;;  %v1565_v41 = vphi %v1926_v41, %v2167_v41   ;;  %v1561_v40 = vphi %v1924_v40, %v2166_v40   ;;  %v1557_v39 = vphi %v1922_v39, %v810_v39   ;;  %v1553_v38 = vphi %v1920_v38, %v811_v38  }
  0xec   : >> { %p572_p6 = scmp.ge.s32.totalorder %s575_s24, 8  }
  0xed   : >> { %v582_v45 = vshra.s32 %v580_v42, 1  ;;  %v586_v46 = vand.u32 1, %v580_v42  ;;  %v583_v48 = vshra.s32 %v581_v44, 1  ;;  %v587_v49 = vand.u32 1, %v581_v44  ;;  %s1222_s12 = sshll.u32 (%p572_p6), %s1628_s22, 3  ;;  %s1041_s15 = sshll.u32 (%p572_p6), %s1918_s21, 4  ;;  %s1042_s15 = int_to_ptr.vmem [resolvable:$true] %s1041_s15 }
  0xee   : > { %s1039_s14 = scalar_lea.hbm (%p572_p6), %s2144_s5, %s1222_s12  ;;  %s1029_s26 = scalar_lea.sflag (%p572_p6), [#allocation4], %s1748_s25 }
  0xef   : >> { %v584_v50 = vadd.s32 %v1565_v41, %v582_v45  ;;  %v585_v51 = vadd.s32 %v1561_v40, %v583_v48  ;;  %s1043_s10 = sshll.u32 (%p572_p6), %s1039_s14, 4  ;;  %s1479_s8 = scalar_lea.hbm (%p572_p6), %s2144_s5, 16  ;;  %s1044_s10 = int_to_ptr.hbm [resolvable:$true] %s1043_s10 }
  0xf0   : > { %s1473_s28 = sshra.s32 (%p572_p6), %s1044_s10, 4  ;;  %s1474_s28 = int_to_ptr.hbm [resolvable:$true] %s1473_s28 }
  0xf1   : >> { %v588_v52 = vadd.s32 %v586_v46, %v584_v50  ;;  %v589_v55 = vadd.s32 %v587_v49, %v585_v51  ;;  %p1480_p0 = scmp.lt.s32.totalorder (%p572_p6), %s1474_s28, %s2144_s5 }
  0xf3   : >> { %v590_v56 = vperm.slane %v588_v52, 0  ;;  %v591_v57 = vperm.slane %v589_v55, 0  ;;  %v1209_v50 = vadd.s32 4294967295, %v588_v52 }
  0xf5   : >> { %vm592_vm7 = vcmp.ge.s32.totalorder %v1878_v54, %v590_v56  ;;  %vm593_vm8 = vcmp.ge.s32.totalorder %v1900_v34, %v591_v57 }
  0xf6   : >> { %v594_v62 = vsel %vm592_vm7, 1, %v1576_v60  ;;  %v595_v15 = vsel %vm593_vm8, 1, %v1576_v60 }
  0xf7   : >> { %v596_v6 = vperm.slane %v594_v62, 0  ;;  %v597_v9 = vperm.slane %v594_v62, 1  ;;  %v598_v32 = vperm.slane %v595_v15, 0  ;;  %v599_v20 = vperm.slane %v595_v15, 1 }
  0xf9   : >> { %v600_v21 = vsel %vm523_vm1, %v596_v6, 0  ;;  %v601_v22 = vsel %vm523_vm1, %v597_v9, 0  ;;  %v615_v37 = vsel %vm523_vm1, %v598_v32, 0  ;;  %v616_v23 = vsel %vm523_vm1, %v599_v20, 0 }
  0xfa   : >> { %v602_v1 = vadd.s32 %v601_v22, %v600_v21  ;;  %v617_v24 = vadd.s32 %v616_v23, %v615_v37  ;;  %v1210_v22 = vadd.s32 4294967295, %v589_v55 }
  0xfc   : >> { %v604_v2 = vshrl.u32 %v602_v1, 16  ;;  %v603_v53 = vand.u32 65535, %v602_v1  ;;  %v619_v29 = vshrl.u32 %v617_v24, 16  ;;  %v618_v30 = vand.u32 65535, %v617_v24 }
  0xfe   : >> { %v606_v27 = vcvt.s32.f32 %v604_v2  ;;  %v605_v28 = vcvt.s32.f32 %v603_v53  ;;  %v621_v33 = vcvt.s32.f32 %v619_v29  ;;  %v620_v42 = vcvt.s32.f32 %v618_v30 }
 0x100   : >> { %609 = vadd.xlane.f32.xlu0 %v606_v27  ;;  %607 = vadd.xlane.f32.xlu1 %v605_v28 }
 0x108   : >> { %624 = vadd.xlane.f32.xlu0 %v621_v33  ;;  %622 = vadd.xlane.f32.xlu1 %v620_v42 }
 0x173   : >> { %v610_v44 = vpop.xlane.xlu0 %609  ;;  %v608_v45 = vpop.xlane.xlu1 %607 }
 0x174   : >> { %v612_v46 = vcvt.f32.s32 %v610_v44  ;;  %v611_v48 = vcvt.f32.s32 %v608_v45 }
 0x176   : >> { %v613_v49 = vshll.u32 %v612_v46, 16 }
 0x178   : >> { %v614_v51 = vadd.s32 %v613_v49, %v611_v48 }
 0x17a   : >> { %vm630_vm9 = vcmp.ge.s32.totalorder %v614_v51, %v1905_v26 }
 0x17b   : >> { %v632_v56 = vsel %vm630_vm9, %v588_v52, %v1565_v41  ;;  %v636_v57 = vsel %vm630_vm9, %v1557_v39, %v1209_v50  ;;  %v625_v62 = vpop.xlane.xlu0 %624  ;;  %v623_v6 = vpop.xlane.xlu1 %622 }
 0x17c   : >> { %v638_v9 = vsub.s32 %v636_v57, %v632_v56  ;;  %v627_v15 = vcvt.f32.s32 %v625_v62  ;;  %v626_v32 = vcvt.f32.s32 %v623_v6 }
 0x17e   : >> { %v640_v20 = vshra.s32 %v638_v9, 1  ;;  %v628_v21 = vshll.u32 %v627_v15, 16  ;;  %v644_v37 = vand.u32 1, %v638_v9 }
 0x180   : >> { %v642_v1 = vadd.s32 %v640_v20, %v632_v56  ;;  %v629_v23 = vadd.s32 %v628_v21, %v626_v32 }
 0x182   : >> { %v646_v2 = vadd.s32 %v644_v37, %v642_v1  ;;  %vm631_vm10 = vcmp.ge.s32.totalorder %v629_v23, %v1910_v36 }
 0x183   : >> { %v633_v53 = vsel %vm631_vm10, %v589_v55, %v1561_v40  ;;  %v637_v24 = vsel %vm631_vm10, %v1553_v38, %v1210_v22  ;;  %vm865_vm10 = vcmask (%p572_p6), 1043456  }
 0x184   : >> { %v639_v41 = vsub.s32 %v637_v24, %v633_v53  ;;  %v648_v39 = vperm.slane %v646_v2, 0 }
 0x186   : >> { %v641_v52 = vshra.s32 %v639_v41, 1  ;;  %vm650_vm11 = vcmp.ge.s32.totalorder %v1878_v54, %v648_v39  ;;  %v645_v29 = vand.u32 1, %v639_v41 }
 0x187   : >> { %v652_v27 = vsel %vm650_vm11, 1, %v1576_v60 }
 0x188   : >> { %v643_v28 = vadd.s32 %v641_v52, %v633_v53  ;;  %v654_v30 = vperm.slane %v652_v27, 0  ;;  %v655_v33 = vperm.slane %v652_v27, 1  ;;  %v1211_v27 = vadd.s32 4294967295, %v646_v2 }
 0x18a   : >> { %v647_v42 = vadd.s32 %v645_v29, %v643_v28  ;;  %v658_v44 = vsel %vm523_vm1, %v654_v30, 0  ;;  %v659_v45 = vsel %vm523_vm1, %v655_v33, 0 }
 0x18b   : >> { %v660_v46 = vadd.s32 %v659_v45, %v658_v44 }
 0x18c   : >> { %v649_v40 = vperm.slane %v647_v42, 0 }
 0x18d   : >> { %v662_v55 = vshrl.u32 %v660_v46, 16  ;;  %v661_v38 = vand.u32 65535, %v660_v46 }
 0x18e   : >> { %vm651_vm12 = vcmp.ge.s32.totalorder %v1900_v34, %v649_v40 }
 0x18f   : >> { %v664_v48 = vcvt.s32.f32 %v662_v55  ;;  %v663_v49 = vcvt.s32.f32 %v661_v38  ;;  %v653_v50 = vsel %vm651_vm12, 1, %v1576_v60 }
 0x190   : >> { %v656_v51 = vperm.slane %v653_v50, 0  ;;  %v657_v62 = vperm.slane %v653_v50, 1  ;;  %v1212_v50 = vadd.s32 4294967295, %v647_v42 }
 0x191   : >> { %667 = vadd.xlane.f32.xlu2 %v664_v48  ;;  %665 = vadd.xlane.f32.xlu0 %v663_v49 }
 0x192   : >> { %v673_v6 = vsel %vm523_vm1, %v656_v51, 0  ;;  %v674_v9 = vsel %vm523_vm1, %v657_v62, 0 }
 0x193   : >> { %v675_v15 = vadd.s32 %v674_v9, %v673_v6 }
 0x195   : >> { %v677_v32 = vshrl.u32 %v675_v15, 16  ;;  %v676_v20 = vand.u32 65535, %v675_v15 }
 0x197   : >> { %v679_v21 = vcvt.s32.f32 %v677_v32  ;;  %v678_v22 = vcvt.s32.f32 %v676_v20 }
 0x199   : >> { %682 = vadd.xlane.f32.xlu2 %v679_v21  ;;  %680 = vadd.xlane.f32.xlu1 %v678_v22 }
 0x204   : >> { %v668_v1 = vpop.xlane.xlu2 %667  ;;  %v666_v37 = vpop.xlane.xlu0 %665 }
 0x205   : >> { %v670_v23 = vcvt.f32.s32 %v668_v1  ;;  %v669_v39 = vcvt.f32.s32 %v666_v37 }
 0x207   : >> { %v671_v41 = vshll.u32 %v670_v23, 16 }
 0x209   : >> { %v672_v52 = vadd.s32 %v671_v41, %v669_v39 }
 0x20b   : >> { %vm688_vm13 = vcmp.ge.s32.totalorder %v672_v52, %v1905_v26 }
 0x20c   : >> { %v690_v28 = vsel %vm688_vm13, %v646_v2, %v632_v56  ;;  %v694_v29 = vsel %vm688_vm13, %v636_v57, %v1211_v27  ;;  %v683_v30 = vpop.xlane.xlu2 %682  ;;  %v681_v33 = vpop.xlane.xlu1 %680 }
 0x20d   : >> { %v696_v44 = vsub.s32 %v694_v29, %v690_v28  ;;  %v685_v45 = vcvt.f32.s32 %v683_v30  ;;  %v684_v55 = vcvt.f32.s32 %v681_v33 }
 0x20f   : >> { %v698_v46 = vshra.s32 %v696_v44, 1  ;;  %v686_v40 = vshll.u32 %v685_v45, 16  ;;  %v702_v48 = vand.u32 1, %v696_v44 }
 0x211   : >> { %v700_v38 = vadd.s32 %v698_v46, %v690_v28  ;;  %v687_v49 = vadd.s32 %v686_v40, %v684_v55 }
 0x213   : >> { %v704_v51 = vadd.s32 %v702_v48, %v700_v38  ;;  %vm689_vm14 = vcmp.ge.s32.totalorder %v687_v49, %v1910_v36 }
 0x214   : >> { %v691_v62 = vsel %vm689_vm14, %v647_v42, %v633_v53  ;;  %v695_v6 = vsel %vm689_vm14, %v637_v24, %v1212_v50 }
 0x215   : >> { %v697_v9 = vsub.s32 %v695_v6, %v691_v62  ;;  %v706_v15 = vperm.slane %v704_v51, 0 }
 0x217   : >> { %v699_v56 = vshra.s32 %v697_v9, 1  ;;  %vm708_vm15 = vcmp.ge.s32.totalorder %v1878_v54, %v706_v15  ;;  %v703_v32 = vand.u32 1, %v697_v9 }
 0x218   : >> { %v710_v57 = vsel %vm708_vm15, 1, %v1576_v60 }
 0x219   : >> { %v701_v2 = vadd.s32 %v699_v56, %v691_v62  ;;  %v712_v20 = vperm.slane %v710_v57, 0  ;;  %v713_v21 = vperm.slane %v710_v57, 1  ;;  %v1213_v57 = vadd.s32 4294967295, %v704_v51 }
 0x21b   : >> { %v705_v22 = vadd.s32 %v703_v32, %v701_v2  ;;  %v716_v1 = vsel %vm523_vm1, %v712_v20, 0  ;;  %v717_v37 = vsel %vm523_vm1, %v713_v21, 0 }
 0x21c   : >> { %v718_v23 = vadd.s32 %v717_v37, %v716_v1 }
 0x21d   : >> { %v707_v41 = vperm.slane %v705_v22, 0 }
 0x21e   : >> { %v720_v53 = vshrl.u32 %v718_v23, 16  ;;  %v719_v24 = vand.u32 65535, %v718_v23 }
 0x21f   : >> { %vm709_vm3 = vcmp.ge.s32.totalorder %v1900_v34, %v707_v41 }
 0x220   : >> { %v722_v42 = vcvt.s32.f32 %v720_v53  ;;  %v721_v39 = vcvt.s32.f32 %v719_v24  ;;  %v711_v52 = vsel %vm709_vm3, 1, %v1576_v60 }
 0x221   : >> { %v714_v27 = vperm.slane %v711_v52, 0  ;;  %v715_v30 = vperm.slane %v711_v52, 1  ;;  %v1214_v52 = vadd.s32 4294967295, %v705_v22 }
 0x222   : >> { %725 = vadd.xlane.f32.xlu2 %v722_v42  ;;  %723 = vadd.xlane.f32.xlu1 %v721_v39 }
 0x223   : >> { %v731_v33 = vsel %vm523_vm1, %v714_v27, 0  ;;  %v732_v44 = vsel %vm523_vm1, %v715_v30, 0 }
 0x224   : >> { %v733_v45 = vadd.s32 %v732_v44, %v731_v33 }
 0x226   : >> { %v735_v46 = vshrl.u32 %v733_v45, 16  ;;  %v734_v40 = vand.u32 65535, %v733_v45 }
 0x228   : >> { %v737_v55 = vcvt.s32.f32 %v735_v46  ;;  %v736_v38 = vcvt.s32.f32 %v734_v40 }
 0x22a   : >> { %740 = vadd.xlane.f32.xlu0 %v737_v55  ;;  %738 = vadd.xlane.f32.xlu2 %v736_v38 }
 0x295   : >> { %v726_v48 = vpop.xlane.xlu2 %725  ;;  %v724_v49 = vpop.xlane.xlu1 %723 }
 0x296   : >> { %v728_v50 = vcvt.f32.s32 %v726_v48  ;;  %v727_v15 = vcvt.f32.s32 %v724_v49 }
 0x298   : >> { %v729_v9 = vshll.u32 %v728_v50, 16 }
 0x29a   : >> { %v730_v56 = vadd.s32 %v729_v9, %v727_v15 }
 0x29c   : >> { %vm746_vm4 = vcmp.ge.s32.totalorder %v730_v56, %v1905_v26 }
 0x29d   : >> { %v748_v2 = vsel %vm746_vm4, %v704_v51, %v690_v28  ;;  %v752_v32 = vsel %vm746_vm4, %v694_v29, %v1213_v57  ;;  %v741_v20 = vpop.xlane.xlu0 %740  ;;  %v739_v21 = vpop.xlane.xlu2 %738  ;;  %vm2042_vm4 = vcmp.eq.s32.totalorder (%p572_p6), %v519_v10, 1 }
 0x29e   : >> { %v754_v1 = vsub.s32 %v752_v32, %v748_v2  ;;  %v743_v37 = vcvt.f32.s32 %v741_v20  ;;  %v742_v53 = vcvt.f32.s32 %v739_v21 }
 0x2a0   : >> { %v756_v23 = vshra.s32 %v754_v1, 1  ;;  %v744_v41 = vshll.u32 %v743_v37, 16  ;;  %v760_v42 = vand.u32 1, %v754_v1 }
 0x2a2   : >> { %v758_v24 = vadd.s32 %v756_v23, %v748_v2  ;;  %v745_v39 = vadd.s32 %v744_v41, %v742_v53 }
 0x2a4   : >> { %v762_v27 = vadd.s32 %v760_v42, %v758_v24  ;;  %vm747_vm5 = vcmp.ge.s32.totalorder %v745_v39, %v1910_v36 }
 0x2a5   : >> { %v749_v30 = vsel %vm747_vm5, %v705_v22, %v691_v62  ;;  %v753_v33 = vsel %vm747_vm5, %v695_v6, %v1214_v52  ;;  %vm2048_vm5 = vcmp.eq.s32.totalorder (%p572_p6), %v520_v11, 1 }
 0x2a6   : >> { %v755_v44 = vsub.s32 %v753_v33, %v749_v30  ;;  %v764_v45 = vperm.slane %v762_v27, 0 }
 0x2a8   : >> { %v757_v28 = vshra.s32 %v755_v44, 1  ;;  %vm766_vm6 = vcmp.ge.s32.totalorder %v1878_v54, %v764_v45  ;;  %v761_v46 = vand.u32 1, %v755_v44 }
 0x2a9   : >> { %v768_v29 = vsel %vm766_vm6, 1, %v1576_v60  ;;  %vm2056_vm6 = vcmp.eq.s32.totalorder (%p572_p6), %v521_v18, 1 }
 0x2aa   : >> { %v759_v51 = vadd.s32 %v757_v28, %v749_v30  ;;  %v770_v40 = vperm.slane %v768_v29, 0  ;;  %v771_v55 = vperm.slane %v768_v29, 1  ;;  %v1215_v28 = vadd.s32 4294967295, %v762_v27 }
 0x2ac   : >> { %v763_v38 = vadd.s32 %v761_v46, %v759_v51  ;;  %v774_v48 = vsel %vm523_vm1, %v770_v40, 0  ;;  %v775_v49 = vsel %vm523_vm1, %v771_v55, 0 }
 0x2ad   : >> { %v776_v50 = vadd.s32 %v775_v49, %v774_v48 }
 0x2ae   : >> { %v765_v9 = vperm.slane %v763_v38, 0 }
 0x2af   : >> { %v778_v62 = vshrl.u32 %v776_v50, 16  ;;  %v777_v6 = vand.u32 65535, %v776_v50  ;;  %v1216_v50 = vadd.s32 4294967295, %v763_v38 }
 0x2b0   : >> { %vm767_vm7 = vcmp.ge.s32.totalorder %v1900_v34, %v765_v9 }
 0x2b1   : >> { %v780_v22 = vcvt.s32.f32 %v778_v62  ;;  %v779_v15 = vcvt.s32.f32 %v777_v6  ;;  %v769_v56 = vsel %vm767_vm7, 1, %v1576_v60  ;;  %v859_v62 = vld [vmem:[%s1914_s20 + $0x8] sm:$0xff] (%p572_p6)  ;;  %vm2062_vm7 = vcmp.eq.s32.totalorder (%p572_p6), %v522_v19, 1 }
 0x2b2   : >> { %v772_v57 = vperm.slane %v769_v56, 0  ;;  %v773_v20 = vperm.slane %v769_v56, 1  ;;  %v860_v6 = vld [vmem:[%s2143_s4] sm:$0x3f] (%p572_p6) }
 0x2b3   : >> { %783 = vadd.xlane.f32.xlu0 %v780_v22  ;;  %781 = vadd.xlane.f32.xlu2 %v779_v15  ;;  %881 = vst.sshfl [vmem:[#allocation1] sm:$0xff pattern:$0x75316420] (%p572_p6), %v860_v6 }
 0x2b4   : >> { %v789_v21 = vsel %vm523_vm1, %v772_v57, 0  ;;  %v790_v1 = vsel %vm523_vm1, %v773_v20, 0  ;;  %885 = vst.sshfl [vmem:[#allocation1 + $0x10] sm:$0xff pattern:$0x75316420] (%p572_p6), %v860_v6 }
 0x2b5   : >> { %v791_v37 = vadd.s32 %v790_v1, %v789_v21  ;;  %v856_v1 = vld [vmem:[%s1762_s13] sm:$0xff] (%p572_p6) }
 0x2b7   : >> { %v793_v23 = vshrl.u32 %v791_v37, 16  ;;  %v792_v41 = vand.u32 65535, %v791_v37  ;;  %v857_v37 = vld [vmem:[%s1762_s13 + $0x8] sm:$0xff] (%p572_p6) }
 0x2b9   : >> { %v795_v53 = vcvt.s32.f32 %v793_v23  ;;  %v794_v24 = vcvt.s32.f32 %v792_v41 }
 0x2bb   : >> { %798 = vadd.xlane.f32.xlu1 %v795_v53  ;;  %796 = vadd.xlane.f32.xlu0 %v794_v24 }
 0x326   : >> { %v784_v42 = vpop.xlane.xlu0 %783  ;;  %v782_v39 = vpop.xlane.xlu2 %781 }
 0x327   : >> { %v786_v52 = vcvt.f32.s32 %v784_v42  ;;  %v785_v60 = vcvt.f32.s32 %v782_v39 }
 0x329   : >> { %v787_v44 = vshll.u32 %v786_v52, 16 }
 0x32b   : >> { %v788_v45 = vadd.s32 %v787_v44, %v785_v60 }
 0x32d   : >> { %vm804_vm8 = vcmp.ge.s32.totalorder %v788_v45, %v1905_v26 }
 0x32e   : >> { %v806_v29 = vsel %vm804_vm8, %v762_v27, %v748_v2   ;;  %v810_v39 = vsel %vm804_vm8, %v752_v32, %v1215_v28   ;;  %v797_v51 = vpop.xlane.xlu0 %796  ;;  %v799_v46 = vpop.xlane.xlu1 %798  ;;  %v822_v27 = vrot.slane (%p572_p6), %v512_v31, 7  ;;  %v861_v31 = vld [vmem:[%s2143_s4 + $0x8] sm:$0x3f] (%p572_p6)  ;;  %vm946_vm8 = vcmask (%p572_p6), 1041408  }
 0x32f   : >> { %v801_v40 = vcvt.f32.s32 %v799_v46  ;;  %v800_v55 = vcvt.f32.s32 %v797_v51  ;;  %v2167_v41 = vmov %v806_v29  ;;  %v812_v2 = vperm.slane (%p572_p6), %v806_v29, 0  ;;  %882 = vst.sshfl [vmem:[#allocation1 + $0x8] sm:$0xff pattern:$0x75316420] (%p572_p6), %v861_v31 }
 0x330   : > { %v824_v61 = vsel (%p572_p6), %vm523_vm1, %v511_v8, %v822_v27  ;;  %886 = vst.sshfl [vmem:[#allocation1 + $0x18] sm:$0xff pattern:$0x75316420] (%p572_p6), %v861_v31 }
 0x331   : >> { %v802_v48 = vshll.u32 %v801_v40, 16  ;;  %vm814_vm11 = vcmp.ge.s32.totalorder (%p572_p6), %v1878_v54, %v812_v2  ;;  %v864_v54 = vrot.slane (%p572_p6), %v861_v31, 4 }
 0x332   : > { %vm816_vm13 = vmor (%p572_p6), %vm515_vm0, %vm814_vm11 }
 0x333   : >> { %v803_v49 = vadd.s32 %v802_v48, %v800_v55  ;;  %574 = sbr.rel (!%p572_p6) target bundleno = 235 (0xeb), region = 124  ;;  %v828_v59 = vsel (%p572_p6), %vm816_vm13, %v824_v61, 0.0  ;;  %v866_v3 = vsel (%p572_p6), %vm865_vm10, %v860_v6, %v864_v54 }
 0x334   : > { %v832_v8 = vperm.slane (%p572_p6), %v828_v59, 0  ;;  %v833_v58 = vperm.slane (%p572_p6), %v828_v59, 1 }
 0x335   : >> { %vm805_vm9 = vcmp.ge.s32.totalorder %v803_v49, %v1910_v36 }
 0x336   : >> { %v807_v9 = vsel %vm805_vm9, %v763_v38, %v749_v30   ;;  %v811_v38 = vsel %vm805_vm9, %v753_v33, %v1216_v50   ;;  %v823_v30 = vrot.slane (%p572_p6), %v514_v17, 7  ;;  %v858_v33 = vld [vmem:[%s1914_s20] sm:$0xff] (%p572_p6)  ;;  %v840_v17 = vsel (%p572_p6), %vm523_vm1, %v832_v8, 0.0  ;;  %s1475_s20 = scalar_lea.hbm (%p572_p6), %s1474_s28, 8 }
 0x337   : >> { %v2166_v40 = vmov %v807_v9  ;;  %v813_v32 = vperm.slane (%p572_p6), %v807_v9, 0  ;;  %1365 = vlog2.f32 (%p572_p6), %v858_v33  ;;  %v868_v0 = vsub.f32 (%p572_p6), %v858_v33, %v866_v3  ;;  %v884_v41 = vld [vmem:[#allocation1 + $0x1] ss:$2 sm:$0xff] (%p572_p6)  ;;  %v888_v44 = vld [vmem:[#allocation1 + $0x11] ss:$2 sm:$0xff] (%p572_p6)  ;;  %p1476_p13 = scmp.ne.s32.totalorder (%p572_p6), %s1474_s28, %s1475_s20  ;;  %p1481_p3 = scmp.lt.s32.totalorder (%p572_p6), %s1479_s8, %s1475_s20 }
 0x338   : > { %v825_v4 = vsel %vm523_vm1, %v513_v16, %v823_v30  ;;  %1367 = vlog2.f32 %v859_v62  ;;  %v869_v16 = vsub.f32 %v859_v62, %v866_v3  ;;  %v841_v5 = vsel %vm523_vm1, %v833_v58, 0.0 }
 0x339   : > { %vm815_vm12 = vcmp.ge.s32.totalorder %v1900_v34, %v813_v32  ;;  %v872_v34 = vrot.slane %v866_v3, 6  ;;  %v842_v26 = vadd.f32 %v841_v5, %v840_v17  ;;  %v870_v38 = vmul.f32 10.0, %v868_v0  ;;  %p1477_p1 = pnand %p1476_p13, %p1653_p11  ;;  %p1482_p4 = por %p1481_p3, %p1480_p0 }
 0x33a   : > { %vm817_vm14 = vmor %vm516_vm2, %vm815_vm12  ;;  %v871_v56 = vmul.f32 10.0, %v869_v16  ;;  %v889_v39 = vrot.slane %v884_v41, 6  ;;  %v890_v60 = vrot.slane %v888_v44, 6 }
 0x33b   : > { %v829_v63 = vsel %vm817_vm14, %v825_v4, 0.0  ;;  %v873_v57 = vrot.slane %v872_v34, 4  ;;  %p1478_p2 = pneg %p1477_p1 }
 0x33c   : > { %v834_v13 = vperm.slane %v829_v63, 0  ;;  %v835_v14 = vperm.slane %v829_v63, 1 }
 0x33d   : > { %v1366_v22 = vpop.eup %1365  ;;  %v875_v53 = vmul.f32 %v873_v57, %v870_v38  ;;  %v876_v24 = vmul.f32 %v873_v57, %v871_v56  ;;  %p1483_p5 = pnand %p1482_p4, %p1478_p2 }
 0x33e   : > { %v843_v36 = vsel %vm523_vm1, %v834_v13, 0.0  ;;  %v845_v15 = vsel %vm523_vm1, %v835_v14, 0.0  ;;  %v1368_v20 = vpop.eup %1367  ;;  %v878_v23 = vmul.f32 0.6931472, %v1366_v22 }
 0x33f   : > { %v844_v21 = vadd.f32 %v843_v36, %v842_v26  ;;  %v880_v42 = vmul.f32 0.6931472, %v1368_v20  ;;  %v897_v28 = vsub.f32 %v856_v1, %v875_v53  ;;  %v898_v29 = vsub.f32 %v857_v37, %v876_v24 }
 0x340   : > { %v893_v45 = vsub.f32 %v878_v23, %v889_v39 }
 0x341   : > { %v846_v52 = vadd.f32 %v845_v15, %v844_v21  ;;  %v894_v51 = vsub.f32 %v880_v42, %v890_v60  ;;  %v899_v40 = vand.u32 2147483647, %v897_v28  ;;  %v900_v55 = vand.u32 2147483647, %v898_v29 }
 0x342   : > { %v895_v46 = vmul.f32 5.0, %v893_v45  ;;  %v903_v48 = vmul.f32 0.5, %v897_v28  ;;  %v904_v49 = vmul.f32 0.5, %v898_v29 }
 0x343   : > { %847 = vadd.xlane.f32.xlu0 %v846_v52  ;;  %v896_v50 = vmul.f32 5.0, %v894_v51  ;;  %vm901_vm0 = vcmp.lt.f32.partialorder %v899_v40, 1.0  ;;  %vm902_vm2 = vcmp.lt.f32.partialorder %v900_v55, 1.0  ;;  %v1217_v9 = vadd.f32 -0.5, %v899_v40 }
 0x344   : > { %v905_v2 = vmul.f32 %v903_v48, %v897_v28  ;;  %v906_v32 = vmul.f32 %v904_v49, %v898_v29  ;;  %v1218_v27 = vadd.f32 -0.5, %v900_v55  ;;  %v911_v30 = vsub.f32 %v856_v1, %v895_v46 }
 0x345   : > { %v912_v33 = vsub.f32 %v857_v37, %v896_v50 }
 0x346   : > { %v909_v62 = vsel %vm901_vm0, %v905_v2, %v1217_v9  ;;  %v910_v6 = vsel %vm902_vm2, %v906_v32, %v1218_v27  ;;  %v913_v61 = vand.u32 2147483647, %v911_v30  ;;  %v917_v4 = vmul.f32 0.5, %v911_v30 }
 0x347   : > { %v914_v31 = vand.u32 2147483647, %v912_v33  ;;  %v918_v54 = vmul.f32 0.5, %v912_v33  ;;  %931 = vst [vmem:[#allocation1] ss:$2 sm:$0xff] %v909_v62  ;;  %v1002_v62 = vsel %vm523_vm1, %v1907_v35, 0 }
 0x348   : > { %935 = vst [vmem:[#allocation1 + $0x10] ss:$2 sm:$0xff] %v910_v6  ;;  %v919_v59 = vmul.f32 %v917_v4, %v911_v30  ;;  %v1219_v63 = vadd.f32 -0.5, %v913_v61  ;;  %vm2032_vm15 = vcmp.lt.f32.partialorder %v913_v61, 1.0 }
 0x349   : > { %v920_v58 = vmul.f32 %v918_v54, %v912_v33  ;;  %v1220_v3 = vadd.f32 -0.5, %v914_v31  ;;  %vm2036_vm3 = vcmp.lt.f32.partialorder %v914_v31, 1.0  ;;  %v1001_v33 = vsel %vm523_vm1, %v1902_v25, 0 }
 0x34a   : > { %v923_v16 = vsel %vm2032_vm15, %v919_v59, %v1219_v63  ;;  %v1003_v6 = vadd.s32 %v1002_v62, %v1001_v33  ;;  %vm1014_vm1 = vcmp.eq.s32.totalorder %v1824_v47, 0 }
 0x34b   : > { %v924_v7 = vsel %vm2036_vm3, %v920_v58, %v1220_v3 }
 0x34c   : > { %v1004_v31 = vrot.slane %v1003_v6, 4 }
 0x34e   : > { %v932_v11 = vld.sshfl [vmem:[#allocation1] sm:$0xff pattern:$0x75316420]  ;;  %v933_v5 = vld.sshfl [vmem:[#allocation1 + $0x8] sm:$0xff pattern:$0x75316420]  ;;  %v1005_v63 = vadd.s32 %v1004_v31, %v1003_v6 }
 0x34f   : > { %v936_v34 = vld.sshfl [vmem:[#allocation1 + $0x10] sm:$0xff pattern:$0x75316420]  ;;  %v937_v26 = vld.sshfl [vmem:[#allocation1 + $0x18] sm:$0xff pattern:$0x75316420] }
 0x350   : > { %v942_v18 = vsel %vm2042_vm4, %v932_v11, 0.0  ;;  %v943_v36 = vsel %vm2048_vm5, %v933_v5, 0.0  ;;  %v944_v12 = vsel %vm2056_vm6, %v936_v34, 0.0  ;;  %v945_v19 = vsel %vm2062_vm7, %v937_v26, 0.0  ;;  %965 = vst [vmem:[#allocation1] ss:$2 sm:$0xff] %v923_v16 }
 0x351   : > { %v947_v38 = vsel %vm946_vm8, %v942_v18, 0.0  ;;  %v948_v22 = vsel %vm946_vm8, %v943_v36, 0.0  ;;  %v950_v15 = vsel %vm946_vm8, %v944_v12, 0.0  ;;  %969 = vst [vmem:[#allocation1 + $0x10] ss:$2 sm:$0xff] %v924_v7  ;;  %v952_v57 = vsel %vm946_vm8, %v945_v19, 0.0 }
 0x352   : > { %v949_v56 = vadd.f32 %v948_v22, %v947_v38  ;;  %v1006_v3 = vrot.slane %v1005_v63, 2  ;;  %v1013_v34 = vand.u32 127, %v360_v43 }
 0x354   : > { %v951_v20 = vadd.f32 %v950_v15, %v949_v56  ;;  %v1007_v16 = vadd.s32 %v1006_v3, %v1005_v63  ;;  %vm1015_vm9 = vcmp.eq.s32.totalorder %v1013_v34, 0  ;;  %vm1019_vm10 = vcmp.eq.s32.totalorder %v1013_v34, 1 }
 0x355   : > { %vm1023_vm11 = vcmp.eq.s32.totalorder %v1013_v34, 2  ;;  %vm1016_vm12 = vmand %vm1014_vm1, %vm1015_vm9 }
 0x356   : > { %v953_v21 = vadd.f32 %v952_v57, %v951_v20  ;;  %v1008_v10 = vrot.slane %v1007_v16, 1  ;;  %vm1020_vm13 = vmand %vm1014_vm1, %vm1019_vm10 }
 0x357   : > { %v966_v1 = vld.sshfl [vmem:[#allocation1] sm:$0xff pattern:$0x75316420]  ;;  %v967_v37 = vld.sshfl [vmem:[#allocation1 + $0x8] sm:$0xff pattern:$0x75316420]  ;;  %vm1024_vm14 = vmand %vm1014_vm1, %vm1023_vm11 }
 0x358   : > { %954 = vadd.xlane.f32.xlu0 %v953_v21  ;;  %v970_v23 = vld.sshfl [vmem:[#allocation1 + $0x10] sm:$0xff pattern:$0x75316420]  ;;  %v971_v41 = vld.sshfl [vmem:[#allocation1 + $0x18] sm:$0xff pattern:$0x75316420]  ;;  %v1009_v11 = vadd.s32 %v1008_v10, %v1007_v16 }
 0x359   : > { %v972_v53 = vrot.slane %v966_v1, 2  ;;  %v973_v24 = vrot.slane %v967_v37, 2  ;;  %v974_v42 = vrot.slane %v970_v23, 2  ;;  %v975_v39 = vrot.slane %v971_v41, 2 }
 0x35b   : > { %v980_v52 = vsel %vm2042_vm4, %v972_v53, 0.0  ;;  %v981_v44 = vsel %vm2048_vm5, %v973_v24, 0.0  ;;  %v982_v60 = vsel %vm2056_vm6, %v974_v42, 0.0  ;;  %v983_v45 = vsel %vm2062_vm7, %v975_v39, 0.0 }
 0x35c   : > { %v984_v28 = vsel %vm946_vm8, %v980_v52, 0.0  ;;  %v985_v29 = vsel %vm946_vm8, %v981_v44, 0.0  ;;  %v987_v51 = vsel %vm946_vm8, %v982_v60, 0.0  ;;  %v989_v40 = vsel %vm946_vm8, %v983_v45, 0.0 }
 0x35d   : > { %v986_v46 = vadd.f32 %v985_v29, %v984_v28 }
 0x35f   : > { %v988_v55 = vadd.f32 %v987_v51, %v986_v46 }
 0x361   : > { %v990_v48 = vadd.f32 %v989_v40, %v988_v55 }
 0x363   : > { %991 = vadd.xlane.f32.xlu1 %v990_v48 }
 0x3b6   : > { %v848_v49 = vpop.xlane.xlu0 %847 }
 0x3b7   : > { %v849_v50 = vrot.slane %v848_v49, 4 }
 0x3b9   : > { %v850_v9 = vadd.f32 %v849_v50, %v848_v49 }
 0x3bb   : > { %v851_v2 = vrot.slane %v850_v9, 2 }
 0x3bd   : > { %v852_v32 = vadd.f32 %v851_v2, %v850_v9 }
 0x3bf   : > { %v853_v27 = vrot.slane %v852_v32, 1 }
 0x3c1   : > { %v854_v30 = vadd.f32 %v853_v27, %v852_v32 }
 0x3c3   : > { %1231 = vpush %v854_v30 }
 0x3cb   : > { %v955_v61 = vpop.xlane.xlu0 %954 }
 0x3cc   : > { %v956_v4 = vrot.slane %v955_v61, 4 }
 0x3ce   : > { %v957_v54 = vadd.f32 %v956_v4, %v955_v61 }
 0x3d0   : > { %v958_v59 = vrot.slane %v957_v54, 2 }
 0x3d2   : > { %v959_v8 = vadd.f32 %v958_v59, %v957_v54 }
 0x3d4   : > { %v960_v58 = vrot.slane %v959_v8, 1 }
 0x3d6   : > { %v992_v13 = vpop.xlane.xlu1 %991  ;;  %v961_v14 = vadd.f32 %v960_v58, %v959_v8 }
 0x3d7   : > { %v993_v0 = vrot.slane %v992_v13, 4 }
 0x3d8   : > { %1233 = vpush %v961_v14 }
 0x3d9   : > { %v994_v25 = vadd.f32 %v993_v0, %v992_v13 }
 0x3db   : > { %v995_v17 = vrot.slane %v994_v25, 2 }
 0x3dd   : > { %v996_v35 = vadd.f32 %v995_v17, %v994_v25 }
 0x3df   : > { %v997_v7 = vrot.slane %v996_v35, 1 }
 0x3e1   : > { %v998_v5 = vadd.f32 %v997_v7, %v996_v35 }
 0x3e3   : > { %1235 = vpush %v998_v5 }
 0x3e4   : > { %1237 = vpush %v1009_v11 }
 0x3f4   : > { %s1232_s16 = spop %1231 }
 0x3f5   : > { %v1021_v26 = vstv %s1232_s16 }
 0x409   : > { %s1234_s27 = spop %1233 }
 0x414   : > { %s1236_s13 = spop %1235 }
 0x415   : > { %s1000_s2 = sadd.f32 %s1236_s13, %s1234_s27  ;;  %s1238_s22 = spop %1237 }
 0x416   : > { %s1011_s6 = scvt.s32.f32 %s1238_s22 }
 0x417   : > { %v1017_v43 = vstv %s1000_s2 }
 0x418   : > { %v1018_v18 = vsel %vm1016_vm12, %v1017_v43, 0.0  ;;  %v1025_v36 = vstv %s1011_s6 }
 0x419   : > { %v1022_v12 = vsel %vm1020_vm13, %v1021_v26, %v1018_v18 }
 0x41a   : > { %v1026_v19 = vsel %vm1024_vm14, %v1025_v36, %v1022_v12 }
 0x41b   : > { %1027 = vst [vmem:[%s1918_s21] sm:$0xff] %v1026_v19 }
 0x41c   : > { %1486 = shalt.err (!%p1483_p5)
}
 0x41d   : > { %1245 = dma.vmem_to_hbm [thread:$0]  (%p1653_p11), %s1042_s15, 128, %s1044_s10, %s1029_s26  }
 0x41e PF: > { %s2180_s25 = sld [smem:[#allocation13_spill]]  ;;  %s1055_s21 = sand.u32 1, %s1537_s18  }
 0x41f   : > { %s1056_s12 = scalar_lea.sflag [#allocation4], %s1055_s21 }
 0x424   : > { %p2181_p7 = scmp.ge.s32.totalorder %s2180_s25, 2 }
 0x426   : > { %p1258_p8 = pnand %p2181_p7, %p1657_p12 }
 0x428   : > { %p1259_p10 = pneg %p1258_p8 }
 0x42a   : > { %1532 = dma.done.wait (%p1259_p10), %s1056_s12, 128  }
 0x42b   : > { %1534 = vsyncadd (%p1259_p10), %s1056_s12, 4294967168  ;;  %s2182_s21 = sld [smem:[#allocation14_spill]]  ;;  %s2185_s18 = smov %s1541_s19 }
 0x42c   : > { %s2183_s16 = sld [smem:[#allocation12_spill]] }
 0x42d   : > { %s2184_s20 = sld [smem:[#allocation15_spill]] }
 0x431   : > { %p21_p9 = scmp.ge.s32.totalorder %s2182_s21, 4  }
 0x432   : > { %s2186_s19 = smov %s2183_s16 }
 0x433   :  { %23 = sbr.rel (!%p21_p9) target bundleno = 9 (0x9), region = 135 }
 0x438   :  { %1062 = vsyncpa [#allocation3], 1 }
 0x439   :  { %1064 = vsyncpa [#allocation3 + $0x1], 1 }
 0x43a   :  { %1065 = vsyncpa [#allocation6], 1 }
 0x43b   :  { %1067 = vsyncpa [#allocation6 + $0x1], 1 }
 0x43c   :  { %1068 = vsyncpa [#allocation4], 1 }
 0x43d   :  { %1070 = vsyncpa [#allocation4 + $0x1], 1 }

</bundles_post_ra>
